<compile_context>
chip_gen: v5e
topology: v5e:2x2
jax: 0.10.0
libtpu: 0.0.40
codegen_flags: <defaults>
</compile_context>

<pallas_src>
import functools
from typing import NamedTuple

import jax
import jax.numpy as jnp
from jax import lax
from jax.experimental import pallas as pl
from jax.experimental.pallas import tpu as pltpu


# Static head configuration (matches the PyTorch module with the hparams above).
CIN = 4                        # FPN feature channels (small test config)
CONV_DIMS = 128 // 4           # num_filters_scale = 4 -> 32
H2, W2 = 16, 16                # p2 level (stride 4 == common_stride)
H3, W3 = 8, 8                  # p3 level (stride 8): +1 scale-head x2 upsample
OUT_H, OUT_W = H2 * 4, W2 * 4  # final x4 (common_stride) bilinear upsample


# ----------------------------------------------------------------------------
# Fused Pallas kernel: whole DepthHead for one batch block of B_BLK samples.
# ----------------------------------------------------------------------------
def _make_depth_head_kernel(b_blk):
  """Builds the kernel for a static batch-block size."""
  rows2 = b_blk * H2             # conv-matmul M rows for the p2 level
  rows3 = b_blk * H3             # conv-matmul M rows for the p3 level
  f32 = jnp.float32

  def kernel(x2_ref, x3_ref, w2k_ref, b2_ref, w3k_ref, b3_ref,
             wp2m_ref, wp3m_ref, mrow_ref, bp_ref, o_ref):
    # x2_ref: (B*16, 64) rows=(sample,h) lanes=(w,ci); x3_ref: (B*8, 32)
    x2 = x2_ref[...]
    x3 = x3_ref[...]

    # h+/-1 shifted conv operands: pltpu.roll (XLU) + iota row mask keeps zero
    # halos at per-sample top/bottom rows (replaces the old im2row scratch).
    h2_idx = lax.broadcasted_iota(jnp.int32, x2.shape, 0) & (H2 - 1)
    h3_idx = lax.broadcasted_iota(jnp.int32, x3.shape, 0) & (H3 - 1)
    x2u = jnp.where(h2_idx != 0,      pltpu.roll(x2, 1, 0),         0.0)  # x[h-1]
    x2d = jnp.where(h2_idx != H2 - 1, pltpu.roll(x2, rows2 - 1, 0), 0.0)  # x[h+1]
    x3u = jnp.where(h3_idx != 0,      pltpu.roll(x3, 1, 0),         0.0)
    x3d = jnp.where(h3_idx != H3 - 1, pltpu.roll(x3, rows3 - 1, 0), 0.0)

    # conv3x3 + bias + ReLU: three banded-weight MXU dots per FPN level
    # (one per kh tap; width taps + 'same' zero padding folded into the weight).
    y2 = jnp.dot(x2u, w2k_ref[0], preferred_element_type=f32)
    y2 = y2 + jnp.dot(x2, w2k_ref[1], preferred_element_type=f32)
    y2 = y2 + jnp.dot(x2d, w2k_ref[2], preferred_element_type=f32)
    y2 = jnp.maximum(y2 + b2_ref[...], 0.0)             # (B*16, 512)

    y3 = jnp.dot(x3u, w3k_ref[0], preferred_element_type=f32)
    y3 = y3 + jnp.dot(x3, w3k_ref[1], preferred_element_type=f32)
    y3 = y3 + jnp.dot(x3d, w3k_ref[2], preferred_element_type=f32)
    y3 = jnp.maximum(y3 + b3_ref[...], 0.0)             # (B*8, 256)

    # 1x1 predictor prefolded with the column (W) bilinear-interp matrices:
    # output lanes are already the 64 final W positions.
    q2 = jnp.dot(y2, wp2m_ref[...], preferred_element_type=f32)    # (B*16, 64)
    q3 = jnp.dot(y3, wp3m_ref[...], preferred_element_type=f32)    # (B*8, 64)

    # Row (H) bilinear interp for both levels, all samples of the block, in one
    # MXU dot against the host-built block-diagonal [M4h | M42h] matrix.
    q = jnp.concatenate([q2, q3], axis=0)               # (B*24, 64)
    o_ref[...] = (jnp.dot(mrow_ref[...], q, preferred_element_type=f32)
                  + bp_ref[...])                         # (B*64, 64)

  return kernel


def _bcast_spec(shape):
  """BlockSpec for a grid-invariant (broadcast) operand."""
  ndim = len(shape)
  return pl.BlockSpec(shape, lambda i, _n=ndim: (0,) * _n)


@functools.partial(jax.jit, static_argnames=("b_blk",))
def _fused_forward(f_p2_nchw, f_p3_nchw, prep, *, b_blk):
  """f_p2: (N, CIN, 16, 16), f_p3: (N, CIN, 8, 8) -> depth_pred (N, 64, 64)."""
  n = f_p2_nchw.shape[0]
  n_pad = ((n + b_blk - 1) // b_blk) * b_blk
  steps = n_pad // b_blk

  # NCHW -> NHWC -> (N*H, W*CIN): the (w, ci) column order matches the folded
  # conv-tap weights; the batch/H merge is a contiguous reshape.
  x2 = jnp.transpose(f_p2_nchw, (0, 2, 3, 1)).reshape(n, H2, W2 * CIN)
  x3 = jnp.transpose(f_p3_nchw, (0, 2, 3, 1)).reshape(n, H3, W3 * CIN)
  if n_pad != n:
    x2 = jnp.pad(x2, ((0, n_pad - n), (0, 0), (0, 0)))
    x3 = jnp.pad(x3, ((0, n_pad - n), (0, 0), (0, 0)))
  x2 = x2.reshape(n_pad * H2, W2 * CIN)
  x3 = x3.reshape(n_pad * H3, W3 * CIN)

  out = pl.pallas_call(
      _make_depth_head_kernel(b_blk),
      out_shape=jax.ShapeDtypeStruct((n_pad * OUT_H, OUT_W), jnp.float32),
      grid=(steps,),
      in_specs=[
          pl.BlockSpec((b_blk * H2, W2 * CIN), lambda i: (i, 0)),
          pl.BlockSpec((b_blk * H3, W3 * CIN), lambda i: (i, 0)),
          _bcast_spec(prep["w2k"].shape),
          _bcast_spec(prep["b2"].shape),
          _bcast_spec(prep["w3k"].shape),
          _bcast_spec(prep["b3"].shape),
          _bcast_spec(prep["wp2m"].shape),
          _bcast_spec(prep["wp3m"].shape),
          _bcast_spec(prep["mrow"].shape),
          _bcast_spec(prep["bp"].shape),
      ],
      out_specs=pl.BlockSpec((b_blk * OUT_H, OUT_W), lambda i: (i, 0)),
      compiler_params=pltpu.CompilerParams(
          dimension_semantics=("parallel",)),   # batch blocks across TensorCores
  )(x2, x3, prep["w2k"], prep["b2"], prep["w3k"], prep["b3"],
    prep["wp2m"], prep["wp3m"], prep["mrow"], prep["bp"])

  return out.reshape(n_pad, OUT_H, OUT_W)[:n]


def pick_batch_block(n, target=16):
  """Samples per grid step.  target=16 -> M=256 conv rows (v6e/v7x MXU); use
  target=8 on v5e.  Keeps >=2 grid steps when the batch permits (megacore)."""
  if n <= 1:
    return 1
  return min(target, (n + 1) // 2)


# ----------------------------------------------------------------------------
# One-time host-side weight folding.
# ----------------------------------------------------------------------------
def _src_index(out_size, in_size):
  """PyTorch F.interpolate(bilinear, align_corners=False) source indices/weights."""
  o = jnp.arange(out_size, dtype=jnp.float32)
  s = (o + 0.5) * (in_size / out_size) - 0.5
  s = jnp.maximum(s, 0.0)                       # PyTorch clamps negatives to 0
  i0 = jnp.minimum(jnp.floor(s).astype(jnp.int32), in_size - 1)
  i1 = jnp.minimum(i0 + 1, in_size - 1)
  w1 = jnp.clip(s - i0.astype(jnp.float32), 0.0, 1.0)
  return i0, i1, w1


def _interp_matrix(out_size, in_size):
  i0, i1, w1 = _src_index(out_size, in_size)
  rows = jnp.arange(out_size)
  m = jnp.zeros((out_size, in_size), jnp.float32)
  m = m.at[rows, i0].add(1.0 - w1)
  m = m.at[rows, i1].add(w1)
  return m


def _conv_tap_matrix(w_hwio, kh, width):
  """(3,3,Cin,Cout) HWIO, one kh tap -> (width*Cin, width*Cout) banded matrix so
  the 'same' conv along width (zero padded) is a single matmul per kh tap."""
  kw_n, cin, cout = w_hwio.shape[1], w_hwio.shape[2], w_hwio.shape[3]
  w_in = jnp.arange(width)[:, None]
  w_out = jnp.arange(width)[None, :]
  kw = w_in - w_out + 1                                  # tap index along width
  valid = (kw >= 0) & (kw < kw_n)
  g = w_hwio[kh][jnp.clip(kw, 0, kw_n - 1)]              # (width, width, Cin, Cout)
  g = jnp.where(valid[:, :, None, None], g, 0.0)
  g = jnp.transpose(g, (0, 2, 1, 3))                     # (w_in, Cin, w_out, Cout)
  return g.reshape(width * cin, width * cout)


def _pred_block_diag(w_pred, width):
  """(CONV_DIMS, 1) 1x1-conv weight -> (width*CONV_DIMS, width) block diagonal."""
  c = w_pred.shape[0]
  eye = jnp.eye(width, dtype=jnp.float32)
  return (eye[:, None, :] * w_pred[None, :, 0, None]).reshape(width * c, width)


def prepare_depth_head_params(params, batch_block):
  """Folds weights for a fixed batch block size (done once, host side)."""
  b = int(batch_block)
  # Row (H) and column (W) bilinear-interp matrices (square spatial dims).
  m2h = _interp_matrix(H2, H3)                  # (16, 8)   x2 upsample (scale head)
  m4h = _interp_matrix(OUT_H, H2)               # (64, 16)  x4 common_stride upsample
  m42h = jnp.dot(m4h, m2h, precision=lax.Precision.HIGHEST)
  m2w = _interp_matrix(W2, W3)
  m4w = _interp_matrix(OUT_W, W2)
  m42w = jnp.dot(m4w, m2w, precision=lax.Precision.HIGHEST)

  # Per-kh-tap banded conv weights.
  w2k = jnp.stack([_conv_tap_matrix(params["w_p2"], kh, W2) for kh in range(3)])
  w3k = jnp.stack([_conv_tap_matrix(params["w_p3"], kh, W3) for kh in range(3)])

  # 1x1 predictor folded with the column-interp matrices (perf review item 2).
  wp2 = _pred_block_diag(params["w_pred"], W2)                     # (512, 16)
  wp3 = _pred_block_diag(params["w_pred"], W3)                     # (256, 8)
  wp2m = jnp.dot(wp2, m4w.T, precision=lax.Precision.HIGHEST)      # (512, 64)
  wp3m = jnp.dot(wp3, m42w.T, precision=lax.Precision.HIGHEST)     # (256, 64)

  # Block-diagonal row-interp matrix for one batch block: q = [q2 rows | q3 rows].
  mrow = jnp.zeros((b * OUT_H, b * (H2 + H3)), jnp.float32)
  for s in range(b):
    mrow = mrow.at[s * OUT_H:(s + 1) * OUT_H, s * H2:(s + 1) * H2].set(m4h)
    mrow = mrow.at[s * OUT_H:(s + 1) * OUT_H,
                   b * H2 + s * H3: b * H2 + (s + 1) * H3].set(m42h)

  return {
      "w2k": w2k,                                      # (3, 64, 512)
      "b2": jnp.tile(params["b_p2"], W2)[None, :],     # (1, 512)
      "w3k": w3k,                                      # (3, 32, 256)
      "b3": jnp.tile(params["b_p3"], W3)[None, :],     # (1, 256)
      "wp2m": wp2m,                                    # (512, 64)
      "wp3m": wp3m,                                    # (256, 64)
      "mrow": mrow,                                    # (B*64, B*24)
      "bp": params["b_pred"].reshape(1, 1),
  }


# ----------------------------------------------------------------------------
# DepthHead forward (mirrors the PyTorch module interface)
# ----------------------------------------------------------------------------
class DepthOutput(NamedTuple):   # data wrapper, no compute
  depth_pred: jax.Array
  hparams: dict


def depth_head_forward(features_nchw, prepared_params, hparams, batch_block):
  """features_nchw: [p2 (N,C,16,16), p3 (N,C,8,8)] matching FPN strides (4, 8)."""
  depth_pred = _fused_forward(features_nchw[0], features_nchw[1],
                              prepared_params, b_blk=int(batch_block))
  return DepthOutput(depth_pred, hparams)


# ----------------------------------------------------------------------------
# Pure-JAX reference (lax.conv + gather-based bilinear, original op order)
# ----------------------------------------------------------------------------
def upsample_bilinear_nhwc(x, scale):
  n, h, w, c = x.shape
  oh, ow = h * scale, w * scale
  h0, h1, wh = _src_index(oh, h)
  w0, w1, ww = _src_index(ow, w)
  top = (x[:, h0, :, :] * (1.0 - wh)[None, :, None, None]
         + x[:, h1, :, :] * wh[None, :, None, None])
  out = (top[:, :, w0, :] * (1.0 - ww)[None, None, :, None]
         + top[:, :, w1, :] * ww[None, None, :, None])
  return out


def reference_forward(features_nchw, params):
  def conv3(x, w, b):
    y = lax.conv_general_dilated(
        x, w, window_strides=(1, 1), padding="SAME",
        dimension_numbers=("NHWC", "HWIO", "NHWC"))
    return jax.nn.relu(y + b)

  x_p2 = jnp.transpose(features_nchw[0], (0, 2, 3, 1))
  x_p3 = jnp.transpose(features_nchw[1], (0, 2, 3, 1))
  y2 = conv3(x_p2, params["w_p2"], params["b_p2"])
  y3 = upsample_bilinear_nhwc(conv3(x_p3, params["w_p3"], params["b_p3"]), 2)
  pred = jnp.einsum("nhwc,co->nhwo", y2 + y3, params["w_pred"]) + params["b_pred"]
  pred = upsample_bilinear_nhwc(pred, 4)
  return pred[..., 0]


# ----------------------------------------------------------------------------
if __name__ == "__main__":
  N = 5                          # exercises batch blocking (B=3), padding, 2 steps
  hparams = {"model_norm": "", "num_filters_scale": 4}

  key = jax.random.PRNGKey(0)
  ks = jax.random.split(key, 8)

  # deterministic synthetic parameters (HWIO conv weights)
  params = {
      "w_p2": 0.1 * jax.random.normal(ks[0], (3, 3, CIN, CONV_DIMS), jnp.float32),
      "b_p2": 0.05 * jax.random.normal(ks[1], (CONV_DIMS,), jnp.float32),
      "w_p3": 0.1 * jax.random.normal(ks[2], (3, 3, CIN, CONV_DIMS), jnp.float32),
      "b_p3": 0.05 * jax.random.normal(ks[3], (CONV_DIMS,), jnp.float32),
      "w_pred": 0.1 * jax.random.normal(ks[4], (CONV_DIMS, 1), jnp.float32),
      "b_pred": 0.05 * jax.random.normal(ks[5], (1,), jnp.float32),
  }

  # FPN features, NCHW like PyTorch (p2 @ stride 4, p3 @ stride 8)
  f_p2 = jax.random.normal(ks[6], (N, CIN, H2, W2), jnp.float32)
  f_p3 = jax.random.normal(ks[7], (N, CIN, H3, W3), jnp.float32)
  features = [f_p2, f_p3]

  b_blk = pick_batch_block(N)                    # batch samples per grid step
  prepared = prepare_depth_head_params(params, b_blk)   # one-time weight folding

  out = depth_head_forward(features, prepared, hparams, b_blk)
  depth_pred = jax.block_until_ready(out.depth_pred)
  assert depth_pred.shape == (N, OUT_H, OUT_W), depth_pred.shape

  ref = jax.block_until_ready(reference_forward(features, params))
  max_err = float(jnp.max(jnp.abs(depth_pred - ref)))
  # tolerance covers f32 matmul reassociation from the fused/commuted formulation
  assert jnp.allclose(depth_pred, ref, atol=5e-4, rtol=5e-4), max_err

  print("KERNEL_OK")
</pallas_src>

<mosaic_0001>
module attributes {stable_mosaic.version = 11 : i64} {
  func.func @kernel(%arg0: i32, %arg1: memref<48x64xf32, #tpu.memory_space<vmem>>, %arg2: memref<24x32xf32, #tpu.memory_space<vmem>>, %arg3: memref<3x64x512xf32, #tpu.memory_space<vmem>>, %arg4: memref<1x512xf32, #tpu.memory_space<vmem>>, %arg5: memref<3x32x256xf32, #tpu.memory_space<vmem>>, %arg6: memref<1x256xf32, #tpu.memory_space<vmem>>, %arg7: memref<512x64xf32, #tpu.memory_space<vmem>>, %arg8: memref<256x64xf32, #tpu.memory_space<vmem>>, %arg9: memref<192x72xf32, #tpu.memory_space<vmem>>, %arg10: memref<1x1xf32, #tpu.memory_space<vmem>>, %arg11: memref<192x64xf32, #tpu.memory_space<vmem>>) attributes {dimension_semantics = [#tpu.dimension_semantics<parallel>], iteration_bounds = array<i64: 2>, scalar_prefetch = 0 : i64, scratch_operands = 0 : i64, tpu.core_type = #tpu.core_type<tc>, window_params = [{transform_indices = @transform_0, window_bounds = array<i64: 48, 64>}, {transform_indices = @transform_1, window_bounds = array<i64: 24, 32>}, {pipeline_mode = #tpu.pipeline_mode<synchronous>, transform_indices = @transform_2, window_bounds = array<i64: 3, 64, 512>}, {pipeline_mode = #tpu.pipeline_mode<synchronous>, transform_indices = @transform_3, window_bounds = array<i64: 1, 512>}, {pipeline_mode = #tpu.pipeline_mode<synchronous>, transform_indices = @transform_4, window_bounds = array<i64: 3, 32, 256>}, {pipeline_mode = #tpu.pipeline_mode<synchronous>, transform_indices = @transform_5, window_bounds = array<i64: 1, 256>}, {pipeline_mode = #tpu.pipeline_mode<synchronous>, transform_indices = @transform_6, window_bounds = array<i64: 512, 64>}, {pipeline_mode = #tpu.pipeline_mode<synchronous>, transform_indices = @transform_7, window_bounds = array<i64: 256, 64>}, {pipeline_mode = #tpu.pipeline_mode<synchronous>, transform_indices = @transform_8, window_bounds = array<i64: 192, 72>}, {pipeline_mode = #tpu.pipeline_mode<synchronous>, transform_indices = @transform_9, window_bounds = array<i64: 1, 1>}, {transform_indices = @transform_10, window_bounds = array<i64: 192, 64>}]} {
    %c0 = arith.constant 0 : index
    %c0_0 = arith.constant 0 : index
    %0 = vector.load %arg1[%c0, %c0_0] : memref<48x64xf32, #tpu.memory_space<vmem>>, vector<48x64xf32>
    %c0_1 = arith.constant 0 : index
    %c0_2 = arith.constant 0 : index
    %1 = vector.load %arg2[%c0_1, %c0_2] : memref<24x32xf32, #tpu.memory_space<vmem>>, vector<24x32xf32>
    %2 = tpu.iota {dimensions = array<i32: 0>} : vector<48x64xi32>
    %c15_i32 = arith.constant 15 : i32
    %3 = vector.broadcast %c15_i32 : i32 to vector<48x64xi32>
    %4 = arith.andi %2, %3 : vector<48x64xi32>
    %5 = tpu.iota {dimensions = array<i32: 0>} : vector<24x32xi32>
    %c7_i32 = arith.constant 7 : i32
    %6 = vector.broadcast %c7_i32 : i32 to vector<24x32xi32>
    %7 = arith.andi %5, %6 : vector<24x32xi32>
    %c0_i32 = arith.constant 0 : i32
    %8 = vector.broadcast %c0_i32 : i32 to vector<48x64xi32>
    %9 = arith.cmpi ne, %4, %8 : vector<48x64xi32>
    %c1_i32 = arith.constant 1 : i32
    %10 = tpu.dynamic_rotate %0 by %c1_i32 dim 0 : vector<48x64xf32>, i32 -> vector<48x64xf32>
    %cst = arith.constant 0.000000e+00 : f32
    %11 = vector.broadcast %cst : f32 to vector<48x64xf32>
    %12 = arith.select %9, %10, %11 : vector<48x64xi1>, vector<48x64xf32>
    %c15_i32_3 = arith.constant 15 : i32
    %13 = vector.broadcast %c15_i32_3 : i32 to vector<48x64xi32>
    %14 = arith.cmpi ne, %4, %13 : vector<48x64xi32>
    %c47_i32 = arith.constant 47 : i32
    %15 = tpu.dynamic_rotate %0 by %c47_i32 dim 0 : vector<48x64xf32>, i32 -> vector<48x64xf32>
    %cst_4 = arith.constant 0.000000e+00 : f32
    %16 = vector.broadcast %cst_4 : f32 to vector<48x64xf32>
    %17 = arith.select %14, %15, %16 : vector<48x64xi1>, vector<48x64xf32>
    %c0_i32_5 = arith.constant 0 : i32
    %18 = vector.broadcast %c0_i32_5 : i32 to vector<24x32xi32>
    %19 = arith.cmpi ne, %7, %18 : vector<24x32xi32>
    %c1_i32_6 = arith.constant 1 : i32
    %20 = tpu.dynamic_rotate %1 by %c1_i32_6 dim 0 : vector<24x32xf32>, i32 -> vector<24x32xf32>
    %cst_7 = arith.constant 0.000000e+00 : f32
    %21 = vector.broadcast %cst_7 : f32 to vector<24x32xf32>
    %22 = arith.select %19, %20, %21 : vector<24x32xi1>, vector<24x32xf32>
    %c7_i32_8 = arith.constant 7 : i32
    %23 = vector.broadcast %c7_i32_8 : i32 to vector<24x32xi32>
    %24 = arith.cmpi ne, %7, %23 : vector<24x32xi32>
    %c23_i32 = arith.constant 23 : i32
    %25 = tpu.dynamic_rotate %1 by %c23_i32 dim 0 : vector<24x32xf32>, i32 -> vector<24x32xf32>
    %cst_9 = arith.constant 0.000000e+00 : f32
    %26 = vector.broadcast %cst_9 : f32 to vector<24x32xf32>
    %27 = arith.select %24, %25, %26 : vector<24x32xi1>, vector<24x32xf32>
    %c0_10 = arith.constant 0 : index
    %c0_11 = arith.constant 0 : index
    %c0_12 = arith.constant 0 : index
    %28 = vector.load %arg3[%c0_10, %c0_11, %c0_12] : memref<3x64x512xf32, #tpu.memory_space<vmem>>, vector<1x64x512xf32>
    %29 = vector.shape_cast %28 : vector<1x64x512xf32> to vector<64x512xf32>
    %cst_13 = arith.constant dense<0.000000e+00> : vector<48x512xf32>
    %30 = tpu.matmul %12, %29, %cst_13 {dimension_numbers = #tpu.dot_dimension_numbers<[1], [0], [0], [1], [0, 0, 1, 1], [], []>} : vector<48x64xf32>, vector<64x512xf32>, vector<48x512xf32> -> vector<48x512xf32>
    %c1 = arith.constant 1 : index
    %c0_14 = arith.constant 0 : index
    %c0_15 = arith.constant 0 : index
    %31 = vector.load %arg3[%c1, %c0_14, %c0_15] : memref<3x64x512xf32, #tpu.memory_space<vmem>>, vector<1x64x512xf32>
    %32 = vector.shape_cast %31 : vector<1x64x512xf32> to vector<64x512xf32>
    %cst_16 = arith.constant dense<0.000000e+00> : vector<48x512xf32>
    %33 = tpu.matmul %0, %32, %cst_16 {dimension_numbers = #tpu.dot_dimension_numbers<[1], [0], [0], [1], [0, 0, 1, 1], [], []>} : vector<48x64xf32>, vector<64x512xf32>, vector<48x512xf32> -> vector<48x512xf32>
    %34 = arith.addf %30, %33 : vector<48x512xf32>
    %c2 = arith.constant 2 : index
    %c0_17 = arith.constant 0 : index
    %c0_18 = arith.constant 0 : index
    %35 = vector.load %arg3[%c2, %c0_17, %c0_18] : memref<3x64x512xf32, #tpu.memory_space<vmem>>, vector<1x64x512xf32>
    %36 = vector.shape_cast %35 : vector<1x64x512xf32> to vector<64x512xf32>
    %cst_19 = arith.constant dense<0.000000e+00> : vector<48x512xf32>
    %37 = tpu.matmul %17, %36, %cst_19 {dimension_numbers = #tpu.dot_dimension_numbers<[1], [0], [0], [1], [0, 0, 1, 1], [], []>} : vector<48x64xf32>, vector<64x512xf32>, vector<48x512xf32> -> vector<48x512xf32>
    %38 = arith.addf %34, %37 : vector<48x512xf32>
    %c0_20 = arith.constant 0 : index
    %c0_21 = arith.constant 0 : index
    %39 = vector.load %arg4[%c0_20, %c0_21] : memref<1x512xf32, #tpu.memory_space<vmem>>, vector<1x512xf32>
    %40 = vector.broadcast %39 : vector<1x512xf32> to vector<48x512xf32>
    %41 = arith.addf %38, %40 : vector<48x512xf32>
    %cst_22 = arith.constant 0.000000e+00 : f32
    %42 = vector.broadcast %cst_22 : f32 to vector<48x512xf32>
    %43 = arith.maximumf %41, %42 : vector<48x512xf32>
    %c0_23 = arith.constant 0 : index
    %c0_24 = arith.constant 0 : index
    %c0_25 = arith.constant 0 : index
    %44 = vector.load %arg5[%c0_23, %c0_24, %c0_25] : memref<3x32x256xf32, #tpu.memory_space<vmem>>, vector<1x32x256xf32>
    %45 = vector.shape_cast %44 : vector<1x32x256xf32> to vector<32x256xf32>
    %cst_26 = arith.constant dense<0.000000e+00> : vector<24x256xf32>
    %46 = tpu.matmul %22, %45, %cst_26 {dimension_numbers = #tpu.dot_dimension_numbers<[1], [0], [0], [1], [0, 0, 1, 1], [], []>} : vector<24x32xf32>, vector<32x256xf32>, vector<24x256xf32> -> vector<24x256xf32>
    %c1_27 = arith.constant 1 : index
    %c0_28 = arith.constant 0 : index
    %c0_29 = arith.constant 0 : index
    %47 = vector.load %arg5[%c1_27, %c0_28, %c0_29] : memref<3x32x256xf32, #tpu.memory_space<vmem>>, vector<1x32x256xf32>
    %48 = vector.shape_cast %47 : vector<1x32x256xf32> to vector<32x256xf32>
    %cst_30 = arith.constant dense<0.000000e+00> : vector<24x256xf32>
    %49 = tpu.matmul %1, %48, %cst_30 {dimension_numbers = #tpu.dot_dimension_numbers<[1], [0], [0], [1], [0, 0, 1, 1], [], []>} : vector<24x32xf32>, vector<32x256xf32>, vector<24x256xf32> -> vector<24x256xf32>
    %50 = arith.addf %46, %49 : vector<24x256xf32>
    %c2_31 = arith.constant 2 : index
    %c0_32 = arith.constant 0 : index
    %c0_33 = arith.constant 0 : index
    %51 = vector.load %arg5[%c2_31, %c0_32, %c0_33] : memref<3x32x256xf32, #tpu.memory_space<vmem>>, vector<1x32x256xf32>
    %52 = vector.shape_cast %51 : vector<1x32x256xf32> to vector<32x256xf32>
    %cst_34 = arith.constant dense<0.000000e+00> : vector<24x256xf32>
    %53 = tpu.matmul %27, %52, %cst_34 {dimension_numbers = #tpu.dot_dimension_numbers<[1], [0], [0], [1], [0, 0, 1, 1], [], []>} : vector<24x32xf32>, vector<32x256xf32>, vector<24x256xf32> -> vector<24x256xf32>
    %54 = arith.addf %50, %53 : vector<24x256xf32>
    %c0_35 = arith.constant 0 : index
    %c0_36 = arith.constant 0 : index
    %55 = vector.load %arg6[%c0_35, %c0_36] : memref<1x256xf32, #tpu.memory_space<vmem>>, vector<1x256xf32>
    %56 = vector.broadcast %55 : vector<1x256xf32> to vector<24x256xf32>
    %57 = arith.addf %54, %56 : vector<24x256xf32>
    %cst_37 = arith.constant 0.000000e+00 : f32
    %58 = vector.broadcast %cst_37 : f32 to vector<24x256xf32>
    %59 = arith.maximumf %57, %58 : vector<24x256xf32>
    %c0_38 = arith.constant 0 : index
    %c0_39 = arith.constant 0 : index
    %60 = vector.load %arg7[%c0_38, %c0_39] : memref<512x64xf32, #tpu.memory_space<vmem>>, vector<512x64xf32>
    %cst_40 = arith.constant dense<0.000000e+00> : vector<48x64xf32>
    %61 = tpu.matmul %43, %60, %cst_40 {dimension_numbers = #tpu.dot_dimension_numbers<[1], [0], [0], [1], [0, 0, 1, 1], [], []>} : vector<48x512xf32>, vector<512x64xf32>, vector<48x64xf32> -> vector<48x64xf32>
    %c0_41 = arith.constant 0 : index
    %c0_42 = arith.constant 0 : index
    %62 = vector.load %arg8[%c0_41, %c0_42] : memref<256x64xf32, #tpu.memory_space<vmem>>, vector<256x64xf32>
    %cst_43 = arith.constant dense<0.000000e+00> : vector<24x64xf32>
    %63 = tpu.matmul %59, %62, %cst_43 {dimension_numbers = #tpu.dot_dimension_numbers<[1], [0], [0], [1], [0, 0, 1, 1], [], []>} : vector<24x256xf32>, vector<256x64xf32>, vector<24x64xf32> -> vector<24x64xf32>
    %64 = tpu.concatenate %61, %63 in 0 : vector<48x64xf32>, vector<24x64xf32> -> vector<72x64xf32>
    %c0_44 = arith.constant 0 : index
    %c0_45 = arith.constant 0 : index
    %65 = vector.load %arg9[%c0_44, %c0_45] : memref<192x72xf32, #tpu.memory_space<vmem>>, vector<192x72xf32>
    %cst_46 = arith.constant dense<0.000000e+00> : vector<192x64xf32>
    %66 = tpu.matmul %65, %64, %cst_46 {dimension_numbers = #tpu.dot_dimension_numbers<[1], [0], [0], [1], [0, 0, 1, 1], [], []>} : vector<192x72xf32>, vector<72x64xf32>, vector<192x64xf32> -> vector<192x64xf32>
    %c0_47 = arith.constant 0 : index
    %c0_48 = arith.constant 0 : index
    %67 = vector.load %arg10[%c0_47, %c0_48] : memref<1x1xf32, #tpu.memory_space<vmem>>, vector<1x1xf32>
    %68 = vector.broadcast %67 : vector<1x1xf32> to vector<192x64xf32>
    %69 = arith.addf %66, %68 : vector<192x64xf32>
    %c0_49 = arith.constant 0 : index
    %c0_50 = arith.constant 0 : index
    %70 = vector.load %arg11[%c0_49, %c0_50] : memref<192x64xf32, #tpu.memory_space<vmem>>, vector<192x64xf32>
    tpu.vector_store %arg11[%c0_49, %c0_50], %69 {strides = array<i32>} : memref<192x64xf32, #tpu.memory_space<vmem>>, vector<192x64xf32>,
    return
  }
  func.func @transform_0(%arg0: i32) -> (i32, i32) {
    %c0_i32 = arith.constant 0 : i32
    %c0_i32_0 = arith.constant 0 : i32
    return %arg0, %c0_i32 : i32, i32
  }
  func.func @transform_1(%arg0: i32) -> (i32, i32) {
    %c0_i32 = arith.constant 0 : i32
    %c0_i32_0 = arith.constant 0 : i32
    return %arg0, %c0_i32 : i32, i32
  }
  func.func @transform_2(%arg0: i32) -> (i32, i32, i32) {
    %c0_i32 = arith.constant 0 : i32
    %c0_i32_0 = arith.constant 0 : i32
    %c0_i32_1 = arith.constant 0 : i32
    %c0_i32_2 = arith.constant 0 : i32
    return %c0_i32, %c0_i32_0, %c0_i32_1 : i32, i32, i32
  }
  func.func @transform_3(%arg0: i32) -> (i32, i32) {
    %c0_i32 = arith.constant 0 : i32
    %c0_i32_0 = arith.constant 0 : i32
    %c0_i32_1 = arith.constant 0 : i32
    return %c0_i32, %c0_i32_0 : i32, i32
  }
  func.func @transform_4(%arg0: i32) -> (i32, i32, i32) {
    %c0_i32 = arith.constant 0 : i32
    %c0_i32_0 = arith.constant 0 : i32
    %c0_i32_1 = arith.constant 0 : i32
    %c0_i32_2 = arith.constant 0 : i32
    return %c0_i32, %c0_i32_0, %c0_i32_1 : i32, i32, i32
  }
  func.func @transform_5(%arg0: i32) -> (i32, i32) {
    %c0_i32 = arith.constant 0 : i32
    %c0_i32_0 = arith.constant 0 : i32
    %c0_i32_1 = arith.constant 0 : i32
    return %c0_i32, %c0_i32_0 : i32, i32
  }
  func.func @transform_6(%arg0: i32) -> (i32, i32) {
    %c0_i32 = arith.constant 0 : i32
    %c0_i32_0 = arith.constant 0 : i32
    %c0_i32_1 = arith.constant 0 : i32
    return %c0_i32, %c0_i32_0 : i32, i32
  }
  func.func @transform_7(%arg0: i32) -> (i32, i32) {
    %c0_i32 = arith.constant 0 : i32
    %c0_i32_0 = arith.constant 0 : i32
    %c0_i32_1 = arith.constant 0 : i32
    return %c0_i32, %c0_i32_0 : i32, i32
  }
  func.func @transform_8(%arg0: i32) -> (i32, i32) {
    %c0_i32 = arith.constant 0 : i32
    %c0_i32_0 = arith.constant 0 : i32
    %c0_i32_1 = arith.constant 0 : i32
    return %c0_i32, %c0_i32_0 : i32, i32
  }
  func.func @transform_9(%arg0: i32) -> (i32, i32) {
    %c0_i32 = arith.constant 0 : i32
    %c0_i32_0 = arith.constant 0 : i32
    %c0_i32_1 = arith.constant 0 : i32
    return %c0_i32, %c0_i32_0 : i32, i32
  }
  func.func @transform_10(%arg0: i32) -> (i32, i32) {
    %c0_i32 = arith.constant 0 : i32
    %c0_i32_0 = arith.constant 0 : i32
    return %arg0, %c0_i32 : i32, i32
  }
}

</mosaic_0001>

<bundles_post_ra>
// kernel: _fused_forward.1
= control target key start
LH: loop header
LB: loop body
LE: loop exit
PB: predicated region body
PF: predicated region fallthrough
CT: control target
= control target key end

     0   :  { %s2230_s15 = smov 0   ;;  %s3573_s0 = inlined_call_operand.vmem [shape: f32[96,64], index: 0, kind: input, shape index: {}]   ;;  %s3574_s1 = inlined_call_operand.vmem [shape: f32[48,32], index: 1, kind: input, shape index: {}]   ;;  %s3575_s2 = inlined_call_operand.vmem [shape: f32[3,64,512], index: 2, kind: input, shape index: {}]   ;;  %s3576_s3 = inlined_call_operand.vmem [shape: f32[1,512], index: 3, kind: input, shape index: {}]   ;;  %s3577_s4 = inlined_call_operand.vmem [shape: f32[3,32,256], index: 4, kind: input, shape index: {}]   ;;  %s3578_s5 = inlined_call_operand.vmem [shape: f32[1,256], index: 5, kind: input, shape index: {}]   ;;  %s3579_s6 = inlined_call_operand.vmem [shape: f32[512,64], index: 6, kind: input, shape index: {}]   ;;  %s3580_s7 = inlined_call_operand.vmem [shape: f32[256,64], index: 7, kind: input, shape index: {}]   ;;  %s3581_s8 = inlined_call_operand.vmem [shape: f32[192,72], index: 8, kind: input, shape index: {}]   ;;  %s3582_s9 = inlined_call_operand.<no memory space> [shape: f32[1,1], index: 9, kind: input, shape index: {}]   ;;  %s3583_s10 = inlined_call_operand.vmem [shape: f32[384,64], index: 10, kind: output, shape index: {}]  }
   0x1   :  { %v15_v0 = vstv %s3582_s9 }
   0x2   :  { %16 = vst [vmem:[#allocation2] sm:$0x1] %v15_v0 }
   0x3 LB: > { %s2236_s16 = sadd.s32 4294967295, %s2169_s15   ;;  %p1952_p0 = scmp.ge.s32.totalorder %s2169_s15, 1  ;;  %s2169_s15 = sphi %s2230_s15, %s22_s15  }
   0x4   : > { %p326_p1 = scmp.lt.s32.totalorder %s2169_s15, 3 }
   0x6   : > { %p327_p2 = pnand %p1952_p0, %p326_p1 }
   0x7   : > { %s369_s22 = smul.u32 (!%p327_p2), 6, %s2236_s16 }
   0x8   : > { %330 = sbr.rel (%p327_p2) target bundleno = 851 (0x353), region = 60 }
   0x9   : > { %p370_p3 = scmp.lt.s32.totalorder (!%p327_p2), %s369_s22, 11  ;;  %s375_s19 = smul.u32 (!%p327_p2), 3, %s2236_s16 }
   0xa   : > { %s381_s21 = smul.u32 (!%p327_p2), 24, %s2236_s16 }
   0xb   : > { %p376_p4 = scmp.lt.s32.totalorder (!%p327_p2), %s375_s19, 5 }
   0xc   : > { %p382_p5 = scmp.lt.s32.totalorder (!%p327_p2), %s381_s21, 47 }
   0xd   : > { %v1984_v1 = vld [vmem:[%s3575_s2 + $0x1e0] sm:$0xff]  ;;  %v1985_v2 = vld [vmem:[%s3575_s2 + $0x1e8] sm:$0xff]  ;;  %v1987_v3 = vld [vmem:[%s3575_s2 + $0x1f8] sm:$0xff]  ;;  %s3585_s22 = smov (!%p370_p3, %s369_s22), 11  ;;  %vm551_vm0 = vcmask 523264   ;;  %v396_v56 = vlaneseq  ;;  %s3587_s19 = smov (!%p376_p4, %s375_s19), 5 }
   0xe   : > { %578 = vmatpush.msra.mxu2 %v1984_v1  ;;  %613 = vmatpush.msra.mxu1 %v1985_v2  ;;  %v1980_v4 = vld [vmem:[%s3575_s2 + $0x1c0] sm:$0xff]  ;;  %v1981_v5 = vld [vmem:[%s3575_s2 + $0x1c8] sm:$0xff]  ;;  %v1983_v6 = vld [vmem:[%s3575_s2 + $0x1d8] sm:$0xff]  ;;  %s1953_s29 = sshll.u32 %s3585_s22, 3  ;;  %s1954_s26 = sshll.u32 %s3587_s19, 3  ;;  %vm1158_vm9 = vcmask 261120  }
   0xf   : > { %683 = vmatpush.msra.mxu3 %v1987_v3  ;;  %v1976_v7 = vld [vmem:[%s3575_s2 + $0x1a0] sm:$0xff]  ;;  %v1977_v8 = vld [vmem:[%s3575_s2 + $0x1a8] sm:$0xff]  ;;  %v1979_v9 = vld [vmem:[%s3575_s2 + $0x1b8] sm:$0xff]  ;;  %s2304_s23 = scalar_lea.vmem %s3573_s0, %s1953_s29  ;;  %v2441_v61 = vshrl.u32 %v396_v56, 7  ;;  %s2790_s13 = scalar_lea.vmem %s3574_s1, %s1954_s26 }
  0x10   : > { %579 = vmatpush.msra.mxu2 %v1980_v4  ;;  %614 = vmatpush.msra.mxu1 %v1981_v5  ;;  %v1972_v10 = vld [vmem:[%s3575_s2 + $0x180] sm:$0xff]  ;;  %v1973_v11 = vld [vmem:[%s3575_s2 + $0x188] sm:$0xff]  ;;  %v1975_v12 = vld [vmem:[%s3575_s2 + $0x198] sm:$0xff]  ;;  %s3589_s21 = smov (!%p382_p5, %s381_s21), 47 }
  0x11   : > { %684 = vmatpush.msra.mxu3 %v1983_v6  ;;  %v1968_v13 = vld [vmem:[%s3575_s2 + $0x160] sm:$0xff]  ;;  %v1969_v14 = vld [vmem:[%s3575_s2 + $0x168] sm:$0xff]  ;;  %v1971_v15 = vld [vmem:[%s3575_s2 + $0x178] sm:$0xff]  ;;  %vm449_vm1 = vcmp.lt.s32.totalorder %v2441_v61, 7  ;;  %v2471_v5 = vadd.s32 8, %v2441_v61  ;;  %vm424_vm3 = vcmp.lt.s32.totalorder %v2441_v61, 1 }
  0x12   : > { %580 = vmatpush.msra.mxu2 %v1976_v7  ;;  %615 = vmatpush.msra.mxu1 %v1977_v8  ;;  %v1964_v16 = vld [vmem:[%s3575_s2 + $0x140] sm:$0xff]  ;;  %v1965_v17 = vld [vmem:[%s3575_s2 + $0x148] sm:$0xff]  ;;  %v1967_v18 = vld [vmem:[%s3575_s2 + $0x158] sm:$0xff]  ;;  %s1955_s26 = sshll.u32 %s3589_s21, 3 }
  0x13   : > { %685 = vmatpush.msra.mxu3 %v1979_v9  ;;  %v1960_v19 = vld [vmem:[%s3575_s2 + $0x120] sm:$0xff]  ;;  %v1961_v20 = vld [vmem:[%s3575_s2 + $0x128] sm:$0xff]  ;;  %v1963_v21 = vld [vmem:[%s3575_s2 + $0x138] sm:$0xff]  ;;  %v404_v7 = vand.u32 15, %v2471_v5  ;;  %s3464_s28 = scalar_lea.vmem %s3583_s10, %s1955_s26 }
  0x14   : > { %581 = vmatpush.msra.mxu2 %v1972_v10  ;;  %616 = vmatpush.msra.mxu1 %v1973_v11  ;;  %v1956_v22 = vld [vmem:[%s3575_s2 + $0x100] sm:$0xff]  ;;  %v1957_v23 = vld [vmem:[%s3575_s2 + $0x108] sm:$0xff]  ;;  %v1959_v24 = vld [vmem:[%s3575_s2 + $0x118] sm:$0xff] }
  0x15   : > { %686 = vmatpush.msra.mxu3 %v1975_v12  ;;  %v2319_v25 = vld [vmem:[%s2304_s23] sm:$0xff]  ;;  %v1986_v26 = vld [vmem:[%s3575_s2 + $0x1f0] sm:$0xff]  ;;  %v515_v30 = vld [vmem:[%s3575_s2 + $0xe8] sm:$0xff]  ;;  %vm438_vm2 = vcmp.ne.s32.totalorder %v404_v7, 15 }
  0x16   : > { %582 = vmatpush.msra.mxu2 %v1968_v13  ;;  %617 = vmatpush.msra.mxu1 %v1969_v14  ;;  %v514_v27 = vld [vmem:[%s3575_s2 + $0xe0] sm:$0xff]  ;;  %v1982_v28 = vld [vmem:[%s3575_s2 + $0x1d0] sm:$0xff]  ;;  %v511_v31 = vld [vmem:[%s3575_s2 + $0xc8] sm:$0xff]  ;;  %v443_v62 = vrot.slane %v2319_v25, 1 }
  0x17   : > { %687 = vmatpush.msra.mxu3 %v1971_v15  ;;  %v510_v29 = vld [vmem:[%s3575_s2 + $0xc0] sm:$0xff]  ;;  %v1978_v32 = vld [vmem:[%s3575_s2 + $0x1b0] sm:$0xff]  ;;  %v507_v34 = vld [vmem:[%s3575_s2 + $0xa8] sm:$0xff] }
  0x18   : > { %583 = vmatpush.msra.mxu2 %v1964_v16  ;;  %618 = vmatpush.msra.mxu1 %v1965_v17  ;;  %v506_v33 = vld [vmem:[%s3575_s2 + $0xa0] sm:$0xff]  ;;  %v2355_v35 = vld [vmem:[%s2304_s23 + $0x8] sm:$0xff]  ;;  %v1974_v37 = vld [vmem:[%s3575_s2 + $0x190] sm:$0xff]  ;;  %v403_v16 = vand.u32 15, %v2441_v61  ;;  %v418_v17 = vrot.slane %v2319_v25, 7 }
  0x19   : > { %688 = vmatpush.msra.mxu3 %v1967_v18  ;;  %v502_v36 = vld [vmem:[%s3575_s2 + $0x80] sm:$0xff]  ;;  %v503_v39 = vld [vmem:[%s3575_s2 + $0x88] sm:$0xff]  ;;  %v1970_v40 = vld [vmem:[%s3575_s2 + $0x170] sm:$0xff]  ;;  %v444_v63 = vrot.slane %v2355_v35, 1 }
  0x1a   : > { %584 = vmatpush.msra.mxu2 %v1960_v19  ;;  %619 = vmatpush.msra.mxu1 %v1961_v20  ;;  %v498_v38 = vld [vmem:[%s3575_s2 + $0x60] sm:$0xff]  ;;  %v499_v42 = vld [vmem:[%s3575_s2 + $0x68] sm:$0xff]  ;;  %v1966_v45 = vld [vmem:[%s3575_s2 + $0x150] sm:$0xff]  ;;  %vm412_vm4 = vcmp.ne.s32.totalorder %v403_v16, 0 }
  0x1b   : > { %689 = vmatpush.msra.mxu3 %v1963_v21  ;;  %v2064_v41 = vld [vmem:[%s3575_s2 + $0x2e0] sm:$0xff]  ;;  %v495_v47 = vld [vmem:[%s3575_s2 + $0x48] sm:$0xff]  ;;  %v2403_v49 = vld [vmem:[%s2304_s23 + $0x10] sm:$0xff]  ;;  %v2468_v4 = vsel %vm449_vm1, %v443_v62, %v444_v63 }
  0x1c   : > { %585 = vmatpush.msra.mxu2 %v1956_v22  ;;  %620 = vmatpush.msra.mxu1 %v1957_v23  ;;  %v494_v43 = vld [vmem:[%s3575_s2 + $0x40] sm:$0xff]  ;;  %v1962_v51 = vld [vmem:[%s3575_s2 + $0x130] sm:$0xff]  ;;  %v491_v52 = vld [vmem:[%s3575_s2 + $0x28] sm:$0xff]  ;;  %v445_v8 = vrot.slane %v2403_v49, 1  ;;  %v400_v23 = vadd.s32 24, %v2441_v61 }
  0x1d   : > { %690 = vmatpush.msra.mxu3 %v1959_v24  ;;  %1988 = vmatmul.msk.f32.vlgmr.msra.gmra.mxu2 %vm551_vm0, %v2319_v25  ;;  %v2060_v44 = vld [vmem:[%s3575_s2 + $0x2c0] sm:$0xff]  ;;  %v1958_v54 = vld [vmem:[%s3575_s2 + $0x110] sm:$0xff]  ;;  %v487_v55 = vld [vmem:[%s3575_s2 + $0x8] sm:$0xff] }
  0x1e   : > { %1994 = vmatmul.msk.f32.vlgmr.msra.gmra.mxu1 %vm551_vm0, %v2319_v25  ;;  %2006 = vmatmul.msk.f32.vlgmr.msra.gmra.mxu3 %vm551_vm0, %v2319_v25  ;;  %v490_v46 = vld [vmem:[%s3575_s2 + $0x20] sm:$0xff]  ;;  %v516_v58 = vld [vmem:[%s3575_s2 + $0xf0] sm:$0xff]  ;;  %v2439_v60 = vld [vmem:[%s2304_s23 + $0x18] sm:$0xff]  ;;  %v453_v9 = vsel %vm449_vm1, %v444_v63, %v445_v8  ;;  %v406_v24 = vand.u32 15, %v400_v23 }
  0x1f   : > { %648 = vmatpush.msrb.mxu2 %v1986_v26  ;;  %736 = vmatpush.msrb.mxu3 %v514_v27  ;;  %v2056_v48 = vld [vmem:[%s3575_s2 + $0x2a0] sm:$0xff]  ;;  %v512_v2 = vld [vmem:[%s3575_s2 + $0xd0] sm:$0xff]  ;;  %v517_v3 = vld [vmem:[%s3575_s2 + $0xf8] sm:$0xff]  ;;  %v2497_v13 = vsel %vm438_vm2, %v453_v9, 0.0  ;;  %v446_v15 = vrot.slane %v2439_v60, 1  ;;  %v421_v63 = vrot.slane %v2439_v60, 7 }
  0x20   : > { %771 = vmatpush.msrb.mxu1 %v515_v30  ;;  %927 = vmatpush.msra.mxu0 %v2064_v41  ;;  %v486_v50 = vld [vmem:[%s3575_s2] sm:$0xff]  ;;  %v508_v10 = vld [vmem:[%s3575_s2 + $0xb0] sm:$0xff]  ;;  %v513_v11 = vld [vmem:[%s3575_s2 + $0xd8] sm:$0xff]  ;;  %vm440_vm5 = vcmp.ne.s32.totalorder %v406_v24, 15 }
  0x21   : > { %649 = vmatpush.msrb.mxu2 %v1982_v28  ;;  %737 = vmatpush.msrb.mxu3 %v510_v29  ;;  %v2052_v53 = vld [vmem:[%s3575_s2 + $0x280] sm:$0xff]  ;;  %v504_v12 = vld [vmem:[%s3575_s2 + $0x90] sm:$0xff]  ;;  %v2500_v14 = vld [vmem:[%s2304_s23 + $0x28] sm:$0xff]  ;;  %v2523_v21 = vsel %vm449_vm1, %v445_v8, %v446_v15 }
  0x22   : > { %772 = vmatpush.msrb.mxu1 %v511_v31  ;;  %928 = vmatpush.msra.mxu0 %v2060_v44  ;;  %v2048_v57 = vld [vmem:[%s3575_s2 + $0x260] sm:$0xff]  ;;  %v423_v18 = vrot.slane %v2500_v14, 7  ;;  %v509_v19 = vld [vmem:[%s3575_s2 + $0xb8] sm:$0xff]  ;;  %v500_v20 = vld [vmem:[%s3575_s2 + $0x70] sm:$0xff]  ;;  %v448_v41 = vrot.slane %v2500_v14, 1 }
  0x23   : > { %650 = vmatpush.msrb.mxu2 %v1978_v32  ;;  %738 = vmatpush.msrb.mxu3 %v506_v33  ;;  %v2044_v59 = vld [vmem:[%s3575_s2 + $0x240] sm:$0xff]  ;;  %v505_v29 = vld [vmem:[%s3575_s2 + $0x98] sm:$0xff]  ;;  %v2065_v30 = vld [vmem:[%s3575_s2 + $0x2e8] sm:$0xff]  ;;  %v419_v32 = vrot.slane %v2355_v35, 7 }
  0x24   : > { %773 = vmatpush.msrb.mxu1 %v507_v34  ;;  %929 = vmatpush.msra.mxu0 %v2056_v48  ;;  %v2040_v0 = vld [vmem:[%s3575_s2 + $0x220] sm:$0xff]  ;;  %v430_v22 = vsel %vm424_vm3, %v423_v18, %v418_v17  ;;  %v496_v31 = vld [vmem:[%s3575_s2 + $0x50] sm:$0xff]  ;;  %v2061_v34 = vld [vmem:[%s3575_s2 + $0x2c8] sm:$0xff] }
  0x25   : > { %1989 = vmatmul.msk.f32.gmra.mxu2 %vm551_vm0, %v2355_v35  ;;  %739 = vmatpush.msrb.mxu3 %v502_v36  ;;  %v2036_v1 = vld [vmem:[%s3575_s2 + $0x200] sm:$0xff]  ;;  %v2533_v27 = vsel %vm412_vm4, %v430_v22, 0.0  ;;  %v501_v36 = vld [vmem:[%s3575_s2 + $0x78] sm:$0xff]  ;;  %v492_v44 = vld [vmem:[%s3575_s2 + $0x30] sm:$0xff] }
  0x26   : > { %1995 = vmatmul.msk.f32.gmra.mxu1 %vm551_vm0, %v2355_v35  ;;  %2007 = vmatmul.msk.f32.gmra.mxu3 %vm551_vm0, %v2355_v35  ;;  %v2474_v6 = vld [vmem:[%s2304_s23 + $0x20] sm:$0xff]  ;;  %v493_v48 = vld [vmem:[%s3575_s2 + $0x38] sm:$0xff]  ;;  %v2098_v23 = vld [vmem:[%s3577_s4 + $0x70] sm:$0xff] }
  0x27   : > { %651 = vmatpush.msrb.mxu2 %v1974_v37  ;;  %740 = vmatpush.msrb.mxu3 %v498_v38  ;;  %v447_v26 = vrot.slane %v2474_v6, 1  ;;  %v2562_v37 = vadd.s32 16, %v2441_v61  ;;  %v2057_v38 = vld [vmem:[%s3575_s2 + $0x2a8] sm:$0xff]  ;;  %v2063_v9 = vld [vmem:[%s3575_s2 + $0x2d8] sm:$0xff] }
  0x28   : > { %774 = vmatpush.msrb.mxu1 %v503_v39  ;;  %930 = vmatpush.msra.mxu0 %v2052_v53  ;;  %v2053_v39 = vld [vmem:[%s3575_s2 + $0x288] sm:$0xff]  ;;  %v402_v53 = vadd.s32 40, %v2441_v61  ;;  %v2051_v16 = vld [vmem:[%s3575_s2 + $0x278] sm:$0xff] }
  0x29   : > { %652 = vmatpush.msrb.mxu2 %v1970_v40  ;;  %741 = vmatpush.msrb.mxu3 %v494_v43  ;;  %v451_v28 = vsel %vm449_vm1, %v446_v15, %v447_v26  ;;  %v2574_v40 = vsel %vm424_vm3, %v418_v17, %v419_v32  ;;  %v420_v43 = vrot.slane %v2403_v49, 7  ;;  %v2046_v15 = vld [vmem:[%s3575_s2 + $0x250] sm:$0xff]  ;;  %v2039_v22 = vld [vmem:[%s3575_s2 + $0x218] sm:$0xff] }
  0x2a   : > { %775 = vmatpush.msrb.mxu1 %v499_v42  ;;  %931 = vmatpush.msra.mxu0 %v2048_v57  ;;  %v2553_v33 = vsel %vm440_vm5, %v451_v28, 0.0  ;;  %v405_v42 = vand.u32 15, %v2562_v37  ;;  %v408_v56 = vand.u32 15, %v402_v53  ;;  %v2042_v17 = vld [vmem:[%s3575_s2 + $0x230] sm:$0xff]  ;;  %v2099_v24 = vld [vmem:[%s3577_s4 + $0x78] sm:$0xff] }
  0x2b   : > { %653 = vmatpush.msrb.mxu2 %v1966_v45  ;;  %742 = vmatpush.msrb.mxu3 %v490_v46  ;;  %v2049_v45 = vld [vmem:[%s3575_s2 + $0x268] sm:$0xff]  ;;  %v497_v46 = vld [vmem:[%s3575_s2 + $0x58] sm:$0xff] }
  0x2c   : > { %776 = vmatpush.msrb.mxu1 %v495_v47  ;;  %932 = vmatpush.msra.mxu0 %v2044_v59  ;;  %v2045_v47 = vld [vmem:[%s3575_s2 + $0x248] sm:$0xff]  ;;  %vm414_vm6 = vcmp.ne.s32.totalorder %v405_v42, 0  ;;  %vm442_vm7 = vcmp.ne.s32.totalorder %v408_v56, 15  ;;  %v2066_v59 = vld [vmem:[%s3575_s2 + $0x2f0] sm:$0xff]  ;;  %v1390_v53 = vld [vmem:[%s3579_s6 + $0x78] sm:$0xff] }
  0x2d   : > { %1990 = vmatmul.msk.f32.gmra.mxu2 %vm551_vm0, %v2403_v49  ;;  %743 = vmatpush.msrb.mxu3 %v486_v50  ;;  %v428_v50 = vsel %vm424_vm3, %v419_v32, %v420_v43  ;;  %v1146_v42 = vld [vmem:[%s3577_s4 + $0x28] sm:$0xff] }
  0x2e   : > { %1996 = vmatmul.msk.f32.gmra.mxu1 %vm551_vm0, %v2403_v49  ;;  %2008 = vmatmul.msk.f32.gmra.mxu3 %vm551_vm0, %v2403_v49  ;;  %v2621_v57 = vsel %vm414_vm6, %v428_v50, 0.0 }
  0x2f   : > { %654 = vmatpush.msrb.mxu2 %v1962_v51  ;;  %777 = vmatpush.msrb.mxu1 %v491_v52  ;;  %v2041_v51 = vld [vmem:[%s3575_s2 + $0x228] sm:$0xff]  ;;  %v488_v52 = vld [vmem:[%s3575_s2 + $0x10] sm:$0xff] }
  0x30   : > { %933 = vmatpush.msra.mxu0 %v2040_v0  ;;  %841 = vmatpush.msra.mxu3 %v517_v3  ;;  %v2067_v3 = vld [vmem:[%s3575_s2 + $0x2f8] sm:$0xff] }
  0x31   : > { %655 = vmatpush.msrb.mxu2 %v1958_v54  ;;  %778 = vmatpush.msrb.mxu1 %v487_v55  ;;  %v489_v54 = vld [vmem:[%s3575_s2 + $0x18] sm:$0xff]  ;;  %v2037_v55 = vld [vmem:[%s3575_s2 + $0x208] sm:$0xff] }
  0x32   : > { %934 = vmatpush.msra.mxu0 %v2036_v1  ;;  %842 = vmatpush.msra.mxu3 %v513_v11  ;;  %v422_v1 = vrot.slane %v2474_v6, 7  ;;  %v2059_v11 = vld [vmem:[%s3575_s2 + $0x2b8] sm:$0xff] }
  0x33   : > { %806 = vmatpush.msra.mxu2 %v516_v58  ;;  %2068 = vmatmul.msk.f32.vlgmr.msra.gmra.mxu0 %vm551_vm0, %v2468_v4  ;;  %v455_v58 = vsel %vm449_vm1, %v448_v41, %v443_v62  ;;  %v401_v62 = vadd.s32 32, %v2441_v61 }
  0x34   : > { %843 = vmatpush.msra.mxu3 %v509_v19  ;;  %962 = vmatpush.msra.mxu1 %v2065_v30  ;;  %v426_v7 = vsel %vm424_vm3, %v421_v63, %v422_v1  ;;  %v2043_v19 = vld [vmem:[%s3575_s2 + $0x238] sm:$0xff] }
  0x35   : > { %1991 = vmatmul.msk.f32.gmra.mxu2 %vm551_vm0, %v2439_v60  ;;  %v407_v0 = vand.u32 15, %v401_v62  ;;  %1180 = vmatpush.msrb.mxu0 %v2098_v23  ;;  %v1148_v30 = vld [vmem:[%s3577_s4 + $0x38] sm:$0xff]  ;;  %v2118_v62 = vld [vmem:[%s3577_s4 + $0xb0] sm:$0xff]  ;;  %v1404_v23 = vld [vmem:[%s3579_s6 + $0xe8] sm:$0xff] }
  0x36   : > { %1997 = vmatmul.msk.f32.gmra.mxu1 %vm551_vm0, %v2439_v60  ;;  %2009 = vmatmul.msk.f32.gmra.mxu3 %vm551_vm0, %v2439_v60 }
  0x37   : > { %807 = vmatpush.msra.mxu2 %v512_v2  ;;  %844 = vmatpush.msra.mxu3 %v505_v29  ;;  %v2062_v2 = vld [vmem:[%s3575_s2 + $0x2d0] sm:$0xff]  ;;  %vm416_vm8 = vcmp.ne.s32.totalorder %v407_v0, 0  ;;  %v1386_v0 = vld [vmem:[%s3579_s6 + $0x58] sm:$0xff] }
  0x38   : > { %963 = vmatpush.msra.mxu1 %v2061_v34  ;;  %v435_v8 = vsel %vm416_vm8, %v426_v7, 0.0  ;;  %v1147_v29 = vld [vmem:[%s3577_s4 + $0x30] sm:$0xff]  ;;  %v2116_v7 = vld [vmem:[%s3577_s4 + $0xa0] sm:$0xff] }
  0x39   : > { %808 = vmatpush.msra.mxu2 %v508_v10  ;;  %845 = vmatpush.msra.mxu3 %v501_v36  ;;  %v2054_v10 = vld [vmem:[%s3575_s2 + $0x290] sm:$0xff] }
  0x3a   : > { %964 = vmatpush.msra.mxu1 %v2057_v38  ;;  %v2094_v36 = vld [vmem:[%s3577_s4 + $0x50] sm:$0xff]  ;;  %v2095_v38 = vld [vmem:[%s3577_s4 + $0x58] sm:$0xff] }
  0x3b   : > { %809 = vmatpush.msra.mxu2 %v504_v12  ;;  %2069 = vmatmul.msk.f32.gmra.mxu0 %vm551_vm0, %v2497_v13  ;;  %v2050_v12 = vld [vmem:[%s3575_s2 + $0x270] sm:$0xff] }
  0x3c   : > { %965 = vmatpush.msra.mxu1 %v2053_v39  ;;  %846 = vmatpush.msra.mxu3 %v497_v46  ;;  %v2803_v46 = vld [vmem:[%s2790_s13] sm:$0xff] }
  0x3d   : > { %1992 = vmatmul.msk.f32.gmra.mxu2 %vm551_vm0, %v2474_v6 }
  0x3e   : > { %1998 = vmatmul.msk.f32.gmra.mxu1 %vm551_vm0, %v2474_v6  ;;  %2010 = vmatmul.msk.f32.gmra.mxu3 %vm551_vm0, %v2474_v6 }
  0x3f   : > { %810 = vmatpush.msra.mxu2 %v500_v20  ;;  %966 = vmatpush.msra.mxu1 %v2049_v45  ;;  %v2038_v20 = vld [vmem:[%s3575_s2 + $0x210] sm:$0xff]  ;;  %v2093_v45 = vld [vmem:[%s3577_s4 + $0x48] sm:$0xff] }
  0x40   : > { %847 = vmatpush.msra.mxu3 %v493_v48 }
  0x41   : > { %811 = vmatpush.msra.mxu2 %v496_v31  ;;  %967 = vmatpush.msra.mxu1 %v2045_v47 }
  0x42   : > { %848 = vmatpush.msra.mxu3 %v489_v54 }
  0x43   : > { %2070 = vmatmul.msk.f32.gmra.mxu0 %vm551_vm0, %v2523_v21  ;;  %812 = vmatpush.msra.mxu2 %v492_v44  ;;  %v2092_v44 = vld [vmem:[%s3577_s4 + $0x40] sm:$0xff] }
  0x44   : > { %968 = vmatpush.msra.mxu1 %v2041_v51  ;;  %v1143_v51 = vld [vmem:[%s3577_s4 + $0x10] sm:$0xff] }
  0x45   : > { %1993 = vmatmul.msk.f32.gmra.mxu2 %vm551_vm0, %v2500_v14 }
  0x46   : > { %1999 = vmatmul.msk.f32.gmra.mxu1 %vm551_vm0, %v2500_v14  ;;  %2011 = vmatmul.msk.f32.gmra.mxu3 %vm551_vm0, %v2500_v14 }
  0x47   : > { %813 = vmatpush.msra.mxu2 %v488_v52  ;;  %969 = vmatpush.msra.mxu1 %v2037_v55  ;;  %v1141_v52 = vld [vmem:[%s3577_s4] sm:$0xff]  ;;  %v1144_v55 = vld [vmem:[%s3577_s4 + $0x18] sm:$0xff] }
  0x4b   : > { %2071 = vmatmul.msk.f32.gmra.mxu0 %vm551_vm0, %v2553_v33 }
  0x4d   : > { %2000 = vmatmul.msk.f32.vlgmr.msrb.gmra.mxu2 %vm551_vm0, %v2319_v25  ;;  %v2637_v25 = vsel %vm442_vm7, %v455_v58, 0.0 }
  0x4e   : > { %2012 = vmatmul.msk.f32.vlgmr.msrb.gmra.mxu3 %vm551_vm0, %v2533_v27  ;;  %2018 = vmatmul.msk.f32.vlgmr.msrb.gmra.mxu1 %vm551_vm0, %v2533_v27 }
  0x4f   : > { %997 = vmatpush.msrb.mxu2 %v2066_v59  ;;  %1032 = vmatpush.msrb.mxu3 %v2067_v3  ;;  %v1142_v59 = vld [vmem:[%s3577_s4 + $0x8] sm:$0xff] }
  0x50   : > { %1206 = vmatpush.msrb.mxu1 %v2099_v24  ;;  %v1382_v24 = vld [vmem:[%s3579_s6 + $0x38] sm:$0xff] }
  0x51   : > { %998 = vmatpush.msrb.mxu2 %v2062_v2  ;;  %1033 = vmatpush.msrb.mxu3 %v2063_v9 }
  0x53   : > { %1034 = vmatpush.msrb.mxu3 %v2059_v11  ;;  %v2115_v11 = vld [vmem:[%s3577_s4 + $0x98] sm:$0xff] }
  0x55   : > { %2001 = vmatmul.msk.f32.gmra.mxu2 %vm551_vm0, %v2355_v35  ;;  %v2596_v35 = vsel %vm449_vm1, %v447_v26, %v448_v41  ;;  %v2096_v26 = vld [vmem:[%s3577_s4 + $0x60] sm:$0xff] }
  0x56   : > { %2013 = vmatmul.msk.f32.gmra.mxu3 %vm551_vm0, %v2574_v40  ;;  %2019 = vmatmul.msk.f32.gmra.mxu1 %vm551_vm0, %v2574_v40  ;;  %v1145_v41 = vld [vmem:[%s3577_s4 + $0x20] sm:$0xff] }
  0x57   : > { %2072 = vmatmul.msk.f32.gmra.mxu0 %vm551_vm0, %v2596_v35 }
  0x58   : > { %1181 = vmatpush.msrb.mxu0 %v2096_v26 }
  0x5a   : > { %1182 = vmatpush.msrb.mxu0 %v2094_v36  ;;  %v1402_v36 = vld [vmem:[%s3579_s6 + $0xd8] sm:$0xff] }
  0x5c   : > { %1183 = vmatpush.msrb.mxu0 %v2092_v44  ;;  %v1401_v44 = vld [vmem:[%s3579_s6 + $0xd0] sm:$0xff] }
  0x5d   : > { %2002 = vmatmul.msk.f32.gmra.mxu2 %vm551_vm0, %v2403_v49  ;;  %v427_v49 = vsel %vm424_vm3, %v420_v43, %v421_v63  ;;  %v1387_v63 = vld [vmem:[%s3579_s6 + $0x60] sm:$0xff] }
  0x5e   : > { %2014 = vmatmul.msk.f32.gmra.mxu3 %vm551_vm0, %v2621_v57  ;;  %2020 = vmatmul.msk.f32.gmra.mxu1 %vm551_vm0, %v2621_v57 }
  0x5f   : > { %2073 = vmatmul.msk.f32.gmra.mxu0 %vm551_vm0, %v2637_v25 }
  0x60   : > { %1311 = vmatpush.msra.mxu0 %v2118_v62  ;;  %v1398_v62 = vld [vmem:[%s3579_s6 + $0xb8] sm:$0xff] }
  0x62   : > { %1312 = vmatpush.msra.mxu0 %v2116_v7  ;;  %v1376_v7 = vld [vmem:[%s3579_s6 + $0x8] sm:$0xff] }
  0x65   : > { %2003 = vmatmul.msk.f32.gmra.mxu2 %vm551_vm0, %v2439_v60  ;;  %v2058_v60 = vld [vmem:[%s3575_s2 + $0x2b0] sm:$0xff] }
  0x66   : > { %2015 = vmatmul.msk.f32.gmra.mxu3 %vm551_vm0, %v427_v49  ;;  %2021 = vmatmul.msk.f32.gmra.mxu1 %vm551_vm0, %v427_v49 }
  0x67   : > { %999 = vmatpush.msrb.mxu2 %v2058_v60  ;;  %2100 = vmatmul.msk.f32.vlgmr.msrb.gmra.mxu0 %vm1158_vm9, %v2803_v46  ;;  %v1385_v60 = vld [vmem:[%s3579_s6 + $0x50] sm:$0xff] }
  0x69   : > { %1000 = vmatpush.msrb.mxu2 %v2054_v10  ;;  %v409_v10 = vand.u32 7, %v2441_v61 }
  0x6b   : > { %1001 = vmatpush.msrb.mxu2 %v2050_v12  ;;  %vm474_vm10 = vcmp.ne.s32.totalorder %v409_v10, 7  ;;  %vm462_vm13 = vcmp.ne.s32.totalorder %v409_v10, 0  ;;  %v1394_v10 = vld [vmem:[%s3579_s6 + $0x98] sm:$0xff] }
  0x6d   : > { %2004 = vmatmul.msk.f32.gmra.mxu2 %vm551_vm0, %v2474_v6  ;;  %v2674_v6 = vsel %vm424_vm3, %v422_v1, %v423_v18  ;;  %v2047_v18 = vld [vmem:[%s3575_s2 + $0x258] sm:$0xff]  ;;  %v2872_v1 = vld [vmem:[%s2790_s13 + $0x10] sm:$0xff] }
  0x6e   : > { %2016 = vmatmul.msk.f32.gmra.mxu3 %vm551_vm0, %v435_v8  ;;  %2022 = vmatmul.msk.f32.gmra.mxu1 %vm551_vm0, %v435_v8 }
  0x6f   : > { %1002 = vmatpush.msrb.mxu2 %v2046_v15  ;;  %v1406_v15 = vld [vmem:[%s3579_s6 + $0xf8] sm:$0xff] }
  0x71   : > { %1003 = vmatpush.msrb.mxu2 %v2042_v17  ;;  %v2113_v17 = vld [vmem:[%s3577_s4 + $0x88] sm:$0xff] }
  0x73   : > { %1004 = vmatpush.msrb.mxu2 %v2038_v20  ;;  %v1405_v20 = vld [vmem:[%s3579_s6 + $0xf0] sm:$0xff] }
  0x75   : > { %2005 = vmatmul.msk.f32.gmra.mxu2 %vm551_vm0, %v2500_v14  ;;  %v2055_v14 = vld [vmem:[%s3575_s2 + $0x298] sm:$0xff] }
  0x76   : > { %2017 = vmatmul.msk.f32.gmra.mxu3 %vm551_vm0, %v2674_v6  ;;  %2023 = vmatmul.msk.f32.gmra.mxu1 %vm551_vm0, %v2674_v6 }
  0x77   : > { %1035 = vmatpush.msrb.mxu3 %v2055_v14  ;;  %v1384_v14 = vld [vmem:[%s3579_s6 + $0x48] sm:$0xff] }
  0x79   : > { %1036 = vmatpush.msrb.mxu3 %v2051_v16  ;;  %v2112_v16 = vld [vmem:[%s3577_s4 + $0x80] sm:$0xff] }
  0x7b   : > { %1037 = vmatpush.msrb.mxu3 %v2047_v18 }
  0x7d   : > { %2024 = vmatmul.msk.f32.vlgmr.msra.gmra.mxu2 %vm551_vm0, %v2533_v27  ;;  %1038 = vmatpush.msrb.mxu3 %v2043_v19  ;;  %v1383_v19 = vld [vmem:[%s3579_s6 + $0x40] sm:$0xff] }
  0x7e   : > { %2030 = vmatmul.msk.f32.vlgmr.msra.gmra.mxu3 %vm551_vm0, %v2533_v27  ;;  %2074 = vmatmul.msk.f32.vlgmr.msra.gmra.mxu1 %vm551_vm0, %v2468_v4  ;;  %v2097_v27 = vld [vmem:[%s3577_s4 + $0x68] sm:$0xff] }
  0x7f   : > { %1039 = vmatpush.msrb.mxu3 %v2039_v22  ;;  %1207 = vmatpush.msrb.mxu1 %v2097_v27 }
  0x80   : > { %1241 = vmatpush.msra.mxu2 %v1147_v29  ;;  %v1381_v29 = vld [vmem:[%s3579_s6 + $0x30] sm:$0xff] }
  0x81   : > { %1267 = vmatpush.msra.mxu3 %v1148_v30  ;;  %1208 = vmatpush.msrb.mxu1 %v2095_v38  ;;  %v410_v30 = vand.u32 7, %v2471_v5  ;;  %v479_v38 = vrot.slane %v2872_v1, 1 }
  0x82   : > { %1242 = vmatpush.msra.mxu2 %v1145_v41 }
  0x83   : > { %1268 = vmatpush.msra.mxu3 %v1146_v42  ;;  %1209 = vmatpush.msrb.mxu1 %v2093_v45  ;;  %v1380_v42 = vld [vmem:[%s3579_s6 + $0x28] sm:$0xff]  ;;  %vm475_vm11 = vcmp.ne.s32.totalorder %v410_v30, 7  ;;  %v1379_v45 = vld [vmem:[%s3579_s6 + $0x20] sm:$0xff]  ;;  %vm463_vm14 = vcmp.ne.s32.totalorder %v410_v30, 0 }
  0x84   : > { %1243 = vmatpush.msra.mxu2 %v1143_v51  ;;  %v3060_v30 = vld [vmem:[%s3576_s3] sm:$0xf] }
  0x85   : > { %2025 = vmatmul.msk.f32.gmra.mxu2 %vm551_vm0, %v2574_v40  ;;  %1269 = vmatpush.msra.mxu3 %v1144_v55  ;;  %v1378_v55 = vld [vmem:[%s3579_s6 + $0x18] sm:$0xff] }
  0x86   : > { %2031 = vmatmul.msk.f32.gmra.mxu3 %vm551_vm0, %v2574_v40  ;;  %2075 = vmatmul.msk.f32.gmra.mxu1 %vm551_vm0, %v2497_v13 }
  0x87   : > { %1244 = vmatpush.msra.mxu2 %v1141_v52  ;;  %1270 = vmatpush.msra.mxu3 %v1142_v59  ;;  %v1377_v59 = vld [vmem:[%s3579_s6 + $0x10] sm:$0xff] }
  0x8d   : > { %2026 = vmatmul.msk.f32.gmra.mxu2 %vm551_vm0, %v2621_v57 }
  0x8e   : > { %2032 = vmatmul.msk.f32.gmra.mxu3 %vm551_vm0, %v2621_v57  ;;  %2076 = vmatmul.msk.f32.gmra.mxu1 %vm551_vm0, %v2523_v21  ;;  %v1388_v57 = vld [vmem:[%s3579_s6 + $0x68] sm:$0xff] }
  0x95   : > { %2027 = vmatmul.msk.f32.gmra.mxu2 %vm551_vm0, %v427_v49 }
  0x96   : > { %2033 = vmatmul.msk.f32.gmra.mxu3 %vm551_vm0, %v427_v49  ;;  %2077 = vmatmul.msk.f32.gmra.mxu1 %vm551_vm0, %v2553_v33  ;;  %v2119_v49 = vld [vmem:[%s3577_s4 + $0xb8] sm:$0xff] }
  0x97   : > { %1337 = vmatpush.msra.mxu1 %v2119_v49  ;;  %v465_v49 = vrot.slane %v2803_v46, 7 }
  0x9b   : > { %v2746_v28 = vpop.f32.mrf.mxu1 }
  0x9d   : > { %2028 = vmatmul.msk.f32.gmra.mxu2 %vm551_vm0, %v435_v8 }
  0x9e   : > { %2034 = vmatmul.msk.f32.gmra.mxu3 %vm551_vm0, %v435_v8  ;;  %2078 = vmatmul.msk.f32.gmra.mxu1 %vm551_vm0, %v2596_v35  ;;  %v2117_v8 = vld [vmem:[%s3577_s4 + $0xa8] sm:$0xff] }
  0x9f   : > { %1338 = vmatpush.msra.mxu1 %v2117_v8 }
  0xa0   : > { %v2759_v31 = vpop.f32.mrf.mxu2 }
  0xa1   : > { %v2761_v32 = vpop.f32.mrf.mxu3  ;;  %1339 = vmatpush.msra.mxu1 %v2115_v11 }
  0xa3   : > { %v2763_v34 = vpop.f32.mrf.mxu1  ;;  %1340 = vmatpush.msra.mxu1 %v2113_v17  ;;  %v1393_v17 = vld [vmem:[%s3579_s6 + $0x90] sm:$0xff] }
  0xa5   : > { %2029 = vmatmul.msk.f32.gmra.mxu2 %vm551_vm0, %v2674_v6 }
  0xa6   : > { %2035 = vmatmul.msk.f32.gmra.mxu3 %vm551_vm0, %v2674_v6  ;;  %2079 = vmatmul.msk.f32.gmra.mxu1 %vm551_vm0, %v2637_v25  ;;  %v2114_v6 = vld [vmem:[%s3577_s4 + $0x90] sm:$0xff] }
  0xa7   : > { %1313 = vmatpush.msra.mxu0 %v2114_v6 }
  0xa8   : > { %v2777_v39 = vpop.f32.mrf.mxu2 }
  0xa9   : > { %v2779_v40 = vpop.f32.mrf.mxu3  ;;  %1314 = vmatpush.msra.mxu0 %v2112_v16 }
  0xab   : > { %v2792_v43 = vpop.f32.mrf.mxu1 }
  0xad   : > { %2080 = vmatmul.msk.f32.vlgmr.msrb.gmra.mxu2 %vm551_vm0, %v2468_v4 }
  0xae   : > { %2086 = vmatmul.msk.f32.vlgmr.msrb.gmra.mxu3 %vm551_vm0, %v2468_v4  ;;  %2103 = vmatmul.msk.f32.vlgmr.msrb.gmra.mxu1 %vm1158_vm9, %v2803_v46  ;;  %v2823_v4 = vld [vmem:[%s2790_s13 + $0x8] sm:$0xff] }
  0xaf   : > { %2101 = vmatmul.msk.f32.gmra.mxu0 %vm1158_vm9, %v2823_v4  ;;  %1439 = vmatpush.msrb.mxu2 %v1390_v53  ;;  %v478_v3 = vrot.slane %v2823_v4, 1  ;;  %v1400_v53 = vld [vmem:[%s3579_s6 + $0xc8] sm:$0xff] }
  0xb0   : > { %v2811_v47 = vpop.f32.mrf.mxu2  ;;  %1474 = vmatpush.msrb.mxu3 %v1406_v15  ;;  %v466_v15 = vrot.slane %v2823_v4, 7 }
  0xb1   : > { %v2813_v48 = vpop.f32.mrf.mxu3  ;;  %v480_v51 = vsel %vm449_vm1, %v478_v3, %v479_v38 }
  0xb2   : > { %1475 = vmatpush.msrb.mxu3 %v1405_v20  ;;  %v484_v52 = vsel %vm475_vm11, %v480_v51, 0.0  ;;  %v3065_v51 = vperm.slane %v3060_v30, 0 }
  0xb3   : > { %v2815_v50 = vpop.f32.mrf.mxu1 }
  0xb4   : > { %1476 = vmatpush.msrb.mxu3 %v1404_v23 }
  0xb5   : > { %2081 = vmatmul.msk.f32.gmra.mxu2 %vm551_vm0, %v2497_v13 }
  0xb6   : > { %2087 = vmatmul.msk.f32.gmra.mxu3 %vm551_vm0, %v2497_v13  ;;  %2104 = vmatmul.msk.f32.gmra.mxu1 %vm1158_vm9, %v2823_v4  ;;  %v1389_v13 = vld [vmem:[%s3579_s6 + $0x70] sm:$0xff]  ;;  %v469_v4 = vsel %vm424_vm3, %v465_v49, %v466_v15 }
  0xb7   : > { %1440 = vmatpush.msrb.mxu2 %v1389_v13  ;;  %2102 = vmatmul.msk.f32.gmra.mxu0 %vm1158_vm9, %v2872_v1 }
  0xb8   : > { %v2837_v54 = vpop.f32.mrf.mxu2 }
  0xb9   : > { %v2845_v56 = vpop.f32.mrf.mxu3  ;;  %1441 = vmatpush.msrb.mxu2 %v1388_v57 }
  0xbb   : > { %v2850_v58 = vpop.f32.mrf.mxu1  ;;  %1442 = vmatpush.msrb.mxu2 %v1387_v63  ;;  %v411_v63 = vand.u32 7, %v2562_v37  ;;  %v1397_v37 = vld [vmem:[%s3579_s6 + $0xb0] sm:$0xff] }
  0xbd   : > { %2082 = vmatmul.msk.f32.gmra.mxu2 %vm551_vm0, %v2523_v21  ;;  %vm476_vm12 = vcmp.ne.s32.totalorder %v411_v63, 7  ;;  %vm464_vm15 = vcmp.ne.s32.totalorder %v411_v63, 0 }
  0xbe   : > { %2088 = vmatmul.msk.f32.gmra.mxu3 %vm551_vm0, %v2523_v21  ;;  %v477_v21 = vrot.slane %v2803_v46, 1  ;;  %2105 = vmatmul.msk.f32.gmra.mxu1 %vm1158_vm9, %v2872_v1  ;;  %v1396_v46 = vld [vmem:[%s3579_s6 + $0xa8] sm:$0xff] }
  0xbf   : > { %1443 = vmatpush.msrb.mxu2 %v1386_v0 }
  0xc0   : > { %v2874_v2 = vpop.f32.mrf.mxu2  ;;  %v481_v18 = vsel %vm449_vm1, %v477_v21, %v478_v3  ;;  %v467_v3 = vrot.slane %v2872_v1, 7  ;;  %v482_v8 = vsel %vm449_vm1, %v479_v38, %v477_v21  ;;  %v1375_v1 = vld [vmem:[%s3579_s6] sm:$0xff]  ;;  %vm1694_vm1 = vcmask 588800  }
  0xc1   : > { %v2891_v9 = vpop.f32.mrf.mxu3  ;;  %1444 = vmatpush.msrb.mxu2 %v1385_v60  ;;  %v483_v22 = vsel %vm474_vm10, %v481_v18, 0.0  ;;  %v485_v60 = vsel %vm476_vm12, %v482_v8, 0.0  ;;  %v936_v18 = vpop.f32.mrf.mxu0  ;;  %v3087_v8 = vperm.slane %v3060_v30, 1 }
  0xc2   : > { %2120 = vmatmul.msk.f32.vlgmr.msra.gmra.mxu0 %vm1158_vm9, %v483_v22  ;;  %v470_v21 = vsel %vm424_vm3, %v467_v3, %v465_v49 }
  0xc3   : > { %v2900_v12 = vpop.f32.mrf.mxu1  ;;  %1445 = vmatpush.msrb.mxu2 %v1384_v14  ;;  %v471_v14 = vsel %vm462_vm13, %v470_v21, 0.0 }
  0xc5   : > { %2083 = vmatmul.msk.f32.gmra.mxu2 %vm551_vm0, %v2553_v33 }
  0xc6   : > { %2089 = vmatmul.msk.f32.gmra.mxu3 %vm551_vm0, %v2553_v33  ;;  %1446 = vmatpush.msrb.mxu2 %v1383_v19  ;;  %v1403_v33 = vld [vmem:[%s3579_s6 + $0xe0] sm:$0xff]  ;;  %v1392_v19 = vld [vmem:[%s3579_s6 + $0x88] sm:$0xff] }
  0xc7   : > { %2123 = vmatmul.msk.f32.vlgmr.msra.gmra.mxu1 %vm1158_vm9, %v483_v22  ;;  %1477 = vmatpush.msrb.mxu3 %v1403_v33  ;;  %v1391_v22 = vld [vmem:[%s3579_s6 + $0x80] sm:$0xff] }
  0xc8   : > { %v2936_v26 = vpop.f32.mrf.mxu2  ;;  %1447 = vmatpush.msrb.mxu2 %v1382_v24  ;;  %v472_v24 = vsel %vm463_vm14, %v469_v4, 0.0 }
  0xc9   : > { %v2942_v27 = vpop.f32.mrf.mxu3  ;;  %1478 = vmatpush.msrb.mxu3 %v1402_v36  ;;  %v939_v36 = vpop.f32.mrf.mxu0 }
  0xca   : > { %1448 = vmatpush.msrb.mxu2 %v1381_v29  ;;  %2121 = vmatmul.msk.f32.gmra.mxu0 %vm1158_vm9, %v484_v52  ;;  %v468_v29 = vsel %vm424_vm3, %v466_v15, %v467_v3 }
  0xcb   : > { %v2953_v41 = vpop.f32.mrf.mxu1  ;;  %1479 = vmatpush.msrb.mxu3 %v1401_v44  ;;  %v473_v44 = vsel %vm464_vm15, %v468_v29, 0.0  ;;  %v1416_v29 = vld [vmem:[%s3579_s6 + $0x148] sm:$0xff] }
  0xcc   : > { %1449 = vmatpush.msrb.mxu2 %v1380_v42 }
  0xcd   : > { %2084 = vmatmul.msk.f32.gmra.mxu2 %vm551_vm0, %v2596_v35  ;;  %1480 = vmatpush.msrb.mxu3 %v1400_v53 }
  0xce   : > { %2090 = vmatmul.msk.f32.gmra.mxu3 %vm551_vm0, %v2596_v35  ;;  %1450 = vmatpush.msrb.mxu2 %v1379_v45  ;;  %v1399_v35 = vld [vmem:[%s3579_s6 + $0xc0] sm:$0xff] }
  0xcf   : > { %2124 = vmatmul.msk.f32.gmra.mxu1 %vm1158_vm9, %v484_v52  ;;  %1481 = vmatpush.msrb.mxu3 %v1399_v35 }
  0xd0   : > { %v2978_v13 = vpop.f32.mrf.mxu2  ;;  %1451 = vmatpush.msrb.mxu2 %v1378_v55 }
  0xd1   : > { %v745_v57 = vpop.f32.mrf.mxu3  ;;  %1482 = vmatpush.msrb.mxu3 %v1398_v62  ;;  %v942_v35 = vpop.f32.mrf.mxu0 }
  0xd2   : > { %1452 = vmatpush.msrb.mxu2 %v1377_v59  ;;  %2122 = vmatmul.msk.f32.gmra.mxu0 %vm1158_vm9, %v485_v60  ;;  %v746_v5 = vadd.f32 %v745_v57, %v2759_v31 }
  0xd3   : > { %v2993_v0 = vpop.f32.mrf.mxu1  ;;  %1483 = vmatpush.msrb.mxu3 %v1397_v37  ;;  %v781_v37 = vadd.f32 %v2953_v41, %v2746_v28  ;;  %v1419_v41 = vld [vmem:[%s3579_s6 + $0x160] sm:$0xff] }
  0xd4   : > { %1453 = vmatpush.msrb.mxu2 %v1376_v7  ;;  %v1059_v45 = vadd.f32 %v936_v18, %v746_v5  ;;  %v1422_v7 = vld [vmem:[%s3579_s6 + $0x178] sm:$0xff]  ;;  %v784_v4 = vadd.f32 %v2993_v0, %v2763_v34  ;;  %v1415_v34 = vld [vmem:[%s3579_s6 + $0x140] sm:$0xff] }
  0xd5   : > { %2085 = vmatmul.msk.f32.gmra.mxu2 %vm551_vm0, %v2637_v25  ;;  %1484 = vmatpush.msrb.mxu3 %v1396_v46  ;;  %v1418_v18 = vld [vmem:[%s3579_s6 + $0x158] sm:$0xff] }
  0xd6   : > { %2091 = vmatmul.msk.f32.gmra.mxu3 %vm551_vm0, %v2637_v25  ;;  %1454 = vmatpush.msrb.mxu2 %v1375_v1  ;;  %v1395_v25 = vld [vmem:[%s3579_s6 + $0xa0] sm:$0xff]  ;;  %v1093_v61 = vadd.f32 %v3065_v51, %v1059_v45  ;;  %v1421_v1 = vld [vmem:[%s3579_s6 + $0x170] sm:$0xff] }
  0xd7   : > { %2125 = vmatmul.msk.f32.gmra.mxu1 %vm1158_vm9, %v485_v60  ;;  %1485 = vmatpush.msrb.mxu3 %v1395_v25 }
  0xd8   : > { %v3020_v6 = vpop.f32.mrf.mxu2  ;;  %v1117_v57 = vmax.f32 %v1093_v61, 0.0  ;;  %1509 = vmatpush.msrb.mxu1 %v1422_v7 }
  0xd9   : > { %v748_v11 = vpop.f32.mrf.mxu3  ;;  %1486 = vmatpush.msrb.mxu3 %v1394_v10  ;;  %v945_v21 = vpop.f32.mrf.mxu0 }
  0xda   : > { %v749_v31 = vadd.f32 %v748_v11, %v2777_v39  ;;  %1510 = vmatpush.msrb.mxu1 %v1421_v1  ;;  %v1420_v11 = vld [vmem:[%s3579_s6 + $0x168] sm:$0xff] }
  0xdb   : > { %v3031_v16 = vpop.f32.mrf.mxu1  ;;  %1487 = vmatpush.msrb.mxu3 %v1393_v17 }
  0xdc   : > { %v1063_v59 = vadd.f32 %v939_v36, %v749_v31  ;;  %1511 = vmatpush.msrb.mxu1 %v1420_v11  ;;  %v1414_v31 = vld [vmem:[%s3579_s6 + $0x138] sm:$0xff] }
  0xdd   : > { %2106 = vmatmul.msk.f32.vlgmr.msra.gmra.mxu2 %vm1158_vm9, %v471_v14  ;;  %1488 = vmatpush.msrb.mxu3 %v1392_v19 }
  0xde   : > { %2109 = vmatmul.msk.f32.vlgmr.msra.gmra.mxu3 %vm1158_vm9, %v471_v14  ;;  %v1097_v62 = vadd.f32 %v3065_v51, %v1063_v59  ;;  %1512 = vmatpush.msrb.mxu1 %v1419_v41  ;;  %v1413_v59 = vld [vmem:[%s3579_s6 + $0x130] sm:$0xff] }
  0xdf   : > { %1489 = vmatpush.msrb.mxu3 %v1391_v22  ;;  %v1417_v22 = vld [vmem:[%s3579_s6 + $0x150] sm:$0xff] }
  0xe0   : > { %v3045_v20 = vpop.f32.mrf.mxu2  ;;  %v1121_v46 = vmax.f32 %v1097_v62, 0.0  ;;  %1513 = vmatpush.msrb.mxu1 %v1418_v18 }
  0xe1   : > { %v751_v23 = vpop.f32.mrf.mxu3  ;;  %v948_v36 = vpop.f32.mrf.mxu0 }
  0xe2   : > { %v752_v49 = vadd.f32 %v751_v23, %v2811_v47  ;;  %1514 = vmatpush.msrb.mxu1 %v1417_v22 }
  0xe3   : > { %v3050_v33 = vpop.f32.mrf.mxu1 }
  0xe4   : > { %v1067_v60 = vadd.f32 %v942_v35, %v752_v49  ;;  %1515 = vmatpush.msrb.mxu1 %v1416_v29  ;;  %v790_v11 = vadd.f32 %v3050_v33, %v2815_v50  ;;  %v1407_v50 = vld [vmem:[%s3579_s6 + $0x100] sm:$0xff] }
  0xe5   : > { %2107 = vmatmul.msk.f32.gmra.mxu2 %vm1158_vm9, %v472_v24 }
  0xe6   : > { %2110 = vmatmul.msk.f32.gmra.mxu3 %vm1158_vm9, %v472_v24  ;;  %v1101_v14 = vadd.f32 %v3065_v51, %v1067_v60  ;;  %1516 = vmatpush.msrb.mxu1 %v1415_v34 }
  0xe8   : > { %v3062_v38 = vpop.f32.mrf.mxu2  ;;  %v1125_v24 = vmax.f32 %v1101_v14, 0.0  ;;  %1517 = vmatpush.msrb.mxu1 %v1414_v31  ;;  %v1436_v31 = vld [vmem:[%s3579_s6 + $0x1e8] sm:$0xff] }
  0xe9   : > { %v754_v42 = vpop.f32.mrf.mxu3  ;;  %v951_v60 = vpop.f32.mrf.mxu0 }
  0xea   : > { %v755_v10 = vadd.f32 %v754_v42, %v2837_v54  ;;  %1518 = vmatpush.msrb.mxu1 %v1413_v59 }
  0xeb   : > { %v3067_v52 = vpop.f32.mrf.mxu1 }
  0xec   : > { %v1071_v54 = vadd.f32 %v945_v21, %v755_v10  ;;  %v1410_v21 = vld [vmem:[%s3579_s6 + $0x118] sm:$0xff]  ;;  %v1408_v10 = vld [vmem:[%s3579_s6 + $0x108] sm:$0xff] }
  0xed   : > { %2108 = vmatmul.msk.f32.gmra.mxu2 %vm1158_vm9, %v473_v44 }
  0xee   : > { %2111 = vmatmul.msk.f32.gmra.mxu3 %vm1158_vm9, %v473_v44  ;;  %v1105_v0 = vadd.f32 %v3065_v51, %v1071_v54  ;;  %v793_v54 = vadd.f32 %v3067_v52, %v2850_v58 }
  0xf0   : > { %v3073_v53 = vpop.f32.mrf.mxu2  ;;  %v1129_v49 = vmax.f32 %v1105_v0, 0.0 }
  0xf1   : > { %v757_v55 = vpop.f32.mrf.mxu3 }
  0xf2   : > { %v758_v44 = vadd.f32 %v757_v55, %v2874_v2  ;;  %v1412_v2 = vld [vmem:[%s3579_s6 + $0x128] sm:$0xff] }
  0xf3   : > { %v3075_v63 = vpop.f32.mrf.mxu1  ;;  %1519 = vmatpush.msrb.mxu1 %v1412_v2 }
  0xf4   : > { %v1075_v55 = vadd.f32 %v948_v36, %v758_v44  ;;  %v1437_v36 = vld [vmem:[%s3579_s6 + $0x1f0] sm:$0xff]  ;;  %v796_v52 = vadd.f32 %v3075_v63, %v2900_v12  ;;  %v1594_v12 = vld [vmem:[%s3580_s7 + $0x78] sm:$0xff] }
  0xf5   : > { %1455 = vmatmul.f32.vlgmr.msrb.gmra.mxu2 %v1117_v57  ;;  %v787_v57 = vadd.f32 %v3031_v16, %v2792_v43  ;;  %v1610_v63 = vld [vmem:[%s3580_s7 + $0xf8] sm:$0xff] }
  0xf6   : > { %v1109_v16 = vadd.f32 %v3065_v51, %v1075_v55  ;;  %1611 = vmatpush.msra.mxu2 %v1594_v12  ;;  %1637 = vmatpush.msra.mxu3 %v1610_v63  ;;  %v1600_v12 = vld [vmem:[%s3580_s7 + $0xa8] sm:$0xff] }
  0xf8   : > { %v3079_v3 = vpop.f32.mrf.mxu2  ;;  %v1133_v41 = vmax.f32 %v1109_v16, 0.0  ;;  %v1592_v16 = vld [vmem:[%s3580_s7 + $0x68] sm:$0xff] }
  0xf9   : > { %v760_v39 = vpop.f32.mrf.mxu3 }
  0xfa   : > { %v761_v1 = vadd.f32 %v760_v39, %v2936_v26  ;;  %v1409_v26 = vld [vmem:[%s3579_s6 + $0x110] sm:$0xff] }
  0xfb   : > { %v971_v47 = vpop.f32.mrf.mxu1 }
  0xfc   : > { %v1060_v25 = vadd.f32 %v971_v47, %v781_v37  ;;  %v1411_v37 = vld [vmem:[%s3579_s6 + $0x120] sm:$0xff]  ;;  %v1079_v39 = vadd.f32 %v951_v60, %v761_v1  ;;  %v1608_v1 = vld [vmem:[%s3580_s7 + $0xe8] sm:$0xff] }
  0xfd   : > { %1458 = vmatmul.f32.gmra.mxu2 %v1121_v46  ;;  %1520 = vmatpush.msrb.mxu1 %v1411_v37 }
  0xfe   : > { %v1094_v28 = vadd.f32 %v3087_v8, %v1060_v25  ;;  %v1113_v33 = vadd.f32 %v3065_v51, %v1079_v39  ;;  %v1438_v51 = vld [vmem:[%s3579_s6 + $0x1f8] sm:$0xff] }
  0xff   : > { %1521 = vmatpush.msrb.mxu1 %v1410_v21  ;;  %v1606_v39 = vld [vmem:[%s3580_s7 + $0xd8] sm:$0xff] }
 0x100   : > { %v1118_v15 = vmax.f32 %v1094_v28, 0.0  ;;  %v3101_v17 = vpop.f32.mrf.mxu2 }
 0x101   : > { %v3106_v19 = vpop.f32.mrf.mxu3  ;;  %1522 = vmatpush.msrb.mxu1 %v1409_v26  ;;  %v816_v37 = vadd.f32 %v3101_v17, %v2978_v13  ;;  %v1591_v13 = vld [vmem:[%s3580_s7 + $0x60] sm:$0xff]  ;;  %v1590_v26 = vld [vmem:[%s3580_s7 + $0x58] sm:$0xff] }
 0x102   : > { %1490 = vmatmul.f32.vlgmr.msrb.gmra.mxu3 %v1118_v15  ;;  %v1607_v17 = vld [vmem:[%s3580_s7 + $0xe0] sm:$0xff] }
 0x103   : > { %v974_v23 = vpop.f32.mrf.mxu1  ;;  %1523 = vmatpush.msrb.mxu1 %v1408_v10 }
 0x104   : > { %v1064_v5 = vadd.f32 %v974_v23, %v784_v4 }
 0x105   : > { %1461 = vmatmul.f32.gmra.mxu2 %v1125_v24  ;;  %1524 = vmatpush.msrb.mxu1 %v1407_v50  ;;  %v1137_v24 = vmax.f32 %v1113_v33, 0.0  ;;  %v1588_v50 = vld [vmem:[%s3580_s7 + $0x48] sm:$0xff] }
 0x106   : > { %v1098_v42 = vadd.f32 %v3087_v8, %v1064_v5 }
 0x107   : > { %1544 = vmatpush.msra.mxu1 %v1438_v51  ;;  %v1586_v51 = vld [vmem:[%s3580_s7 + $0x38] sm:$0xff] }
 0x108   : > { %v1122_v45 = vmax.f32 %v1098_v42, 0.0  ;;  %v3122_v61 = vpop.f32.mrf.mxu2 }
 0x109   : > { %v3127_v35 = vpop.f32.mrf.mxu3  ;;  %1545 = vmatpush.msra.mxu1 %v1437_v36  ;;  %v819_v33 = vadd.f32 %v3122_v61, %v3020_v6  ;;  %v1603_v6 = vld [vmem:[%s3580_s7 + $0xc0] sm:$0xff]  ;;  %v1602_v36 = vld [vmem:[%s3580_s7 + $0xb8] sm:$0xff] }
 0x10a   : > { %1493 = vmatmul.f32.gmra.mxu3 %v1122_v45 }
 0x10b   : > { %v977_v62 = vpop.f32.mrf.mxu1  ;;  %1546 = vmatpush.msra.mxu1 %v1436_v31  ;;  %v3287_v31 = vpop.f32.mrf.mxu0 }
 0x10c   : > { %v1068_v7 = vadd.f32 %v977_v62, %v787_v57  ;;  %v1435_v57 = vld [vmem:[%s3579_s6 + $0x1e0] sm:$0xff]  ;;  %v1609_v62 = vld [vmem:[%s3580_s7 + $0xf0] sm:$0xff] }
 0x10d   : > { %1464 = vmatmul.f32.gmra.mxu2 %v1129_v49  ;;  %1547 = vmatpush.msra.mxu1 %v1435_v57  ;;  %v1434_v49 = vld [vmem:[%s3579_s6 + $0x1d8] sm:$0xff]  ;;  %v1427_v57 = vld [vmem:[%s3579_s6 + $0x1a0] sm:$0xff] }
 0x10e   : > { %v1102_v43 = vadd.f32 %v3087_v8, %v1068_v7  ;;  %1638 = vmatpush.msra.mxu3 %v1609_v62  ;;  %v1433_v7 = vld [vmem:[%s3579_s6 + $0x1d0] sm:$0xff] }
 0x10f   : > { %1548 = vmatpush.msra.mxu1 %v1434_v49  ;;  %v1426_v49 = vld [vmem:[%s3579_s6 + $0x198] sm:$0xff] }
 0x110   : > { %v1126_v47 = vmax.f32 %v1102_v43, 0.0  ;;  %v3143_v46 = vpop.f32.mrf.mxu2  ;;  %v3214_v43 = vperm.slane %v3060_v30, 2  ;;  %1639 = vmatpush.msra.mxu3 %v1608_v1  ;;  %v1582_v1 = vld [vmem:[%s3580_s7 + $0x18] sm:$0xff] }
 0x111   : > { %v3148_v25 = vpop.f32.mrf.mxu3  ;;  %1549 = vmatpush.msra.mxu1 %v1433_v7  ;;  %v822_v63 = vadd.f32 %v3143_v46, %v3045_v20  ;;  %v1583_v7 = vld [vmem:[%s3580_s7 + $0x20] sm:$0xff] }
 0x112   : > { %1496 = vmatmul.f32.gmra.mxu3 %v1126_v47  ;;  %v1432_v47 = vld [vmem:[%s3579_s6 + $0x1c8] sm:$0xff] }
 0x113   : > { %v980_v28 = vpop.f32.mrf.mxu1  ;;  %1640 = vmatpush.msra.mxu3 %v1607_v17  ;;  %1550 = vmatpush.msra.mxu1 %v1432_v47  ;;  %v1581_v17 = vld [vmem:[%s3580_s7 + $0x10] sm:$0xff] }
 0x114   : > { %v1072_v14 = vadd.f32 %v980_v28, %v790_v11 }
 0x115   : > { %1467 = vmatmul.f32.gmra.mxu2 %v1133_v41  ;;  %1641 = vmatpush.msra.mxu3 %v1606_v39  ;;  %v1589_v41 = vld [vmem:[%s3580_s7 + $0x50] sm:$0xff]  ;;  %v1423_v39 = vld [vmem:[%s3579_s6 + $0x180] sm:$0xff] }
 0x116   : > { %v1106_v15 = vadd.f32 %v3087_v8, %v1072_v14  ;;  %v1605_v14 = vld [vmem:[%s3580_s7 + $0xd0] sm:$0xff] }
 0x117   : > { %1642 = vmatpush.msra.mxu3 %v1605_v14 }
 0x118   : > { %v1130_v18 = vmax.f32 %v1106_v15, 0.0  ;;  %v3163_v4 = vpop.f32.mrf.mxu2  ;;  %v1431_v15 = vld [vmem:[%s3579_s6 + $0x1c0] sm:$0xff] }
 0x119   : > { %v3165_v22 = vpop.f32.mrf.mxu3  ;;  %1551 = vmatpush.msra.mxu1 %v1431_v15  ;;  %v825_v14 = vadd.f32 %v3163_v4, %v3062_v38 }
 0x11a   : > { %1499 = vmatmul.f32.gmra.mxu3 %v1130_v18  ;;  %v1430_v18 = vld [vmem:[%s3579_s6 + $0x1b8] sm:$0xff] }
 0x11b   : > { %v983_v23 = vpop.f32.mrf.mxu1  ;;  %1552 = vmatpush.msra.mxu1 %v1430_v18 }
 0x11c   : > { %v1076_v5 = vadd.f32 %v983_v23, %v793_v54  ;;  %v1604_v54 = vld [vmem:[%s3580_s7 + $0xc8] sm:$0xff] }
 0x11d   : > { %1470 = vmatmul.f32.gmra.mxu2 %v1137_v24  ;;  %v1587_v24 = vld [vmem:[%s3580_s7 + $0x40] sm:$0xff]  ;;  %1643 = vmatpush.msra.mxu3 %v1604_v54 }
 0x11e   : > { %v1110_v29 = vadd.f32 %v3087_v8, %v1076_v5 }
 0x11f   : > { %1644 = vmatpush.msra.mxu3 %v1603_v6 }
 0x120   : > { %v1134_v42 = vmax.f32 %v1110_v29, 0.0  ;;  %v3176_v34 = vpop.f32.mrf.mxu2  ;;  %v1429_v29 = vld [vmem:[%s3579_s6 + $0x1b0] sm:$0xff] }
 0x121   : > { %v3178_v58 = vpop.f32.mrf.mxu3  ;;  %1553 = vmatpush.msra.mxu1 %v1429_v29  ;;  %1645 = vmatpush.msra.mxu3 %v1602_v36 }
 0x122   : > { %1502 = vmatmul.f32.gmra.mxu3 %v1134_v42 }
 0x123   : > { %v986_v0 = vpop.f32.mrf.mxu1 }
 0x124   : > { %v1080_v44 = vadd.f32 %v986_v0, %v796_v52  ;;  %v1428_v52 = vld [vmem:[%s3579_s6 + $0x1a8] sm:$0xff]  ;;  %v1585_v0 = vld [vmem:[%s3580_s7 + $0x30] sm:$0xff] }
 0x125   : > { %1554 = vmatpush.msra.mxu1 %v1428_v52 }
 0x126   : > { %v1114_v45 = vadd.f32 %v3087_v8, %v1080_v44  ;;  %v1593_v8 = vld [vmem:[%s3580_s7 + $0x70] sm:$0xff] }
 0x127   : > { %1612 = vmatpush.msra.mxu2 %v1593_v8  ;;  %v1601_v44 = vld [vmem:[%s3580_s7 + $0xb0] sm:$0xff]  ;;  %1555 = vmatpush.msra.mxu1 %v1427_v57 }
 0x128   : > { %v1138_v59 = vmax.f32 %v1114_v45, 0.0  ;;  %v3189_v2 = vpop.f32.mrf.mxu2  ;;  %1646 = vmatpush.msra.mxu3 %v1601_v44 }
 0x129   : > { %v3191_v55 = vpop.f32.mrf.mxu3  ;;  %1613 = vmatpush.msra.mxu2 %v1592_v16  ;;  %1556 = vmatpush.msra.mxu1 %v1426_v49  ;;  %v1425_v16 = vld [vmem:[%s3579_s6 + $0x190] sm:$0xff] }
 0x12a   : > { %1505 = vmatmul.f32.gmra.mxu3 %v1138_v59  ;;  %v1584_v59 = vld [vmem:[%s3580_s7 + $0x28] sm:$0xff] }
 0x12b   : > { %1614 = vmatpush.msra.mxu2 %v1591_v13  ;;  %v3300_v8 = vpop.f32.mrf.mxu1  ;;  %1647 = vmatpush.msra.mxu3 %v1600_v12  ;;  %v1424_v13 = vld [vmem:[%s3579_s6 + $0x188] sm:$0xff] }
 0x12c   : > { %1557 = vmatpush.msra.mxu1 %v1425_v16  ;;  %v1188_v15 = vpop.f32.mrf.mxu0 }
 0x12d   : > { %1615 = vmatpush.msra.mxu2 %v1590_v26 }
 0x12e   : > { %1558 = vmatpush.msra.mxu1 %v1424_v13 }
 0x12f   : > { %1616 = vmatpush.msra.mxu2 %v1589_v41  ;;  %v1596_v41 = vld [vmem:[%s3580_s7 + $0x88] sm:$0xff] }
 0x130   : > { %v1006_v60 = vpop.f32.mrf.mxu2  ;;  %1559 = vmatpush.msra.mxu1 %v1423_v39 }
 0x131   : > { %v1061_v21 = vadd.f32 %v1006_v60, %v816_v37  ;;  %v3231_v11 = vpop.f32.mrf.mxu3  ;;  %1617 = vmatpush.msra.mxu2 %v1588_v50  ;;  %v1599_v37 = vld [vmem:[%s3580_s7 + $0xa0] sm:$0xff]  ;;  %v1598_v60 = vld [vmem:[%s3580_s7 + $0x98] sm:$0xff] }
 0x132   : > { %1648 = vmatpush.msra.mxu3 %v1599_v37  ;;  %v1579_v50 = vld [vmem:[%s3580_s7] sm:$0xff] }
 0x133   : > { %v1095_v28 = vadd.f32 %v3214_v43, %v1061_v21  ;;  %1618 = vmatpush.msra.mxu2 %v1587_v24  ;;  %v1597_v21 = vld [vmem:[%s3580_s7 + $0x90] sm:$0xff]  ;;  %v828_v24 = vadd.f32 %v3176_v34, %v3073_v53  ;;  %v851_v53 = vadd.f32 %v3106_v19, %v2761_v32 }
 0x134   : > { %1649 = vmatpush.msra.mxu3 %v1598_v60 }
 0x135   : > { %v1119_v10 = vmax.f32 %v1095_v28, 0.0  ;;  %1619 = vmatpush.msra.mxu2 %v1586_v51  ;;  %v1580_v28 = vld [vmem:[%s3580_s7 + $0x8] sm:$0xff]  ;;  %v1191_v51 = vpop.f32.mrf.mxu0  ;;  %v1062_v12 = vadd.f32 %v3231_v11, %v851_v53 }
 0x136   : > { %1650 = vmatpush.msra.mxu3 %v1597_v21 }
 0x137   : > { %1525 = vmatmul.f32.vlgmr.msrb.gmra.mxu1 %v1119_v10  ;;  %1620 = vmatpush.msra.mxu2 %v1585_v0  ;;  %v831_v0 = vadd.f32 %v3189_v2, %v3079_v3  ;;  %v1357_v3 = vld [vmem:[%s3578_s5] sm:$0x3] }
 0x138   : > { %v1009_v23 = vpop.f32.mrf.mxu2  ;;  %1651 = vmatpush.msra.mxu3 %v1596_v41  ;;  %v1360_v11 = vperm.slane %v1357_v3, 1 }
 0x139   : > { %v1065_v61 = vadd.f32 %v1009_v23, %v819_v33  ;;  %v3266_v5 = vpop.f32.mrf.mxu3  ;;  %1621 = vmatpush.msra.mxu2 %v1584_v59  ;;  %v1595_v33 = vld [vmem:[%s3580_s7 + $0x80] sm:$0xff]  ;;  %v1214_v23 = vpop.f32.mrf.mxu1 }
 0x13a   : > { %1652 = vmatpush.msra.mxu3 %v1595_v33 }
 0x13b   : > { %v1099_v42 = vadd.f32 %v3214_v43, %v1065_v61  ;;  %1622 = vmatpush.msra.mxu2 %v1583_v7 }
 0x13d   : > { %v1123_v45 = vmax.f32 %v1099_v42, 0.0  ;;  %1623 = vmatpush.msra.mxu2 %v1582_v1 }
 0x13f   : > { %1528 = vmatmul.f32.gmra.mxu1 %v1123_v45  ;;  %1624 = vmatpush.msra.mxu2 %v1581_v17  ;;  %v1316_v59 = vpop.f32.mrf.mxu0 }
 0x140   : > { %v1012_v62 = vpop.f32.mrf.mxu2 }
 0x141   : > { %v1069_v20 = vadd.f32 %v1012_v62, %v822_v63  ;;  %v3311_v46 = vpop.f32.mrf.mxu3  ;;  %1625 = vmatpush.msra.mxu2 %v1580_v28  ;;  %v1217_v42 = vpop.f32.mrf.mxu1  ;;  %v3366_v63 = vperm.slane %v3060_v30, 3  ;;  %v854_v30 = vadd.f32 %v3127_v35, %v2779_v40  ;;  %v857_v40 = vadd.f32 %v3148_v25, %v2813_v48 }
 0x142   : > { %v860_v48 = vadd.f32 %v3165_v22, %v2845_v56 }
 0x143   : > { %v1103_v47 = vadd.f32 %v3214_v43, %v1069_v20  ;;  %1626 = vmatpush.msra.mxu2 %v1579_v50  ;;  %v1096_v7 = vadd.f32 %v3366_v63, %v1062_v12  ;;  %v1066_v60 = vadd.f32 %v3266_v5, %v854_v30  ;;  %v1070_v50 = vadd.f32 %v3311_v46, %v857_v40 }
 0x145   : > { %v1127_v26 = vmax.f32 %v1103_v47, 0.0  ;;  %v1120_v1 = vmax.f32 %v1096_v7, 0.0  ;;  %v1100_v28 = vadd.f32 %v3366_v63, %v1066_v60 }
 0x147   : > { %1531 = vmatmul.f32.gmra.mxu1 %v1127_v26  ;;  %v1319_v17 = vpop.f32.mrf.mxu0 }
 0x148   : > { %v1015_v10 = vpop.f32.mrf.mxu2 }
 0x149   : > { %v1073_v18 = vadd.f32 %v1015_v10, %v825_v14  ;;  %v3349_v54 = vpop.f32.mrf.mxu3  ;;  %v1342_v49 = vpop.f32.mrf.mxu1  ;;  %v1124_v10 = vmax.f32 %v1100_v28, 0.0 }
 0x14b   : > { %v1107_v38 = vadd.f32 %v3214_v43, %v1073_v18 }
 0x14d   : > { %v1131_v4 = vmax.f32 %v1107_v38, 0.0 }
 0x14f   : > { %1534 = vmatmul.f32.gmra.mxu1 %v1131_v4 }
 0x150   : > { %v1018_v6 = vpop.f32.mrf.mxu2 }
 0x151   : > { %v1077_v61 = vadd.f32 %v1018_v6, %v828_v24  ;;  %v3354_v29 = vpop.f32.mrf.mxu3  ;;  %v1345_v26 = vpop.f32.mrf.mxu1 }
 0x152   : > { %v1322_v6 = vpop.f32.mrf.mxu0 }
 0x153   : > { %v1111_v36 = vadd.f32 %v3214_v43, %v1077_v61 }
 0x155   : > { %v1135_v52 = vmax.f32 %v1111_v36, 0.0 }
 0x157   : > { %1537 = vmatmul.f32.gmra.mxu1 %v1135_v52 }
 0x158   : > { %v1021_v44 = vpop.f32.mrf.mxu2 }
 0x159   : > { %v1081_v45 = vadd.f32 %v1021_v44, %v831_v0  ;;  %v3359_v57 = vpop.f32.mrf.mxu3  ;;  %v1348_v36 = vpop.f32.mrf.mxu1  ;;  %v1074_v44 = vadd.f32 %v3349_v54, %v860_v48  ;;  %v866_v54 = vadd.f32 %v3191_v55, %v2942_v27 }
 0x15b   : > { %v1115_v34 = vadd.f32 %v3214_v43, %v1081_v45  ;;  %v1359_v43 = vperm.slane %v1357_v3, 0  ;;  %v1082_v3 = vadd.f32 %v3359_v57, %v866_v54  ;;  %v1670_v54 = vld [vmem:[%s3581_s8 + $0x38] sm:$0xff] }
 0x15d   : > { %v1139_v62 = vmax.f32 %v1115_v34, 0.0 }
 0x15f   : > { %1540 = vmatmul.f32.gmra.mxu1 %v1139_v62 }
 0x160   : > { %v1246_v2 = vpop.f32.mrf.mxu2 }
 0x161   : > { %v1247_v32 = vadd.f32 %v1246_v2, %v3287_v31  ;;  %v1272_v19 = vpop.f32.mrf.mxu3 }
 0x162   : > { %v1273_v37 = vadd.f32 %v1272_v19, %v3300_v8 }
 0x163   : > { %v1351_v20 = vadd.f32 %v1316_v59, %v1247_v32  ;;  %v1116_v32 = vadd.f32 %v3366_v63, %v1082_v3  ;;  %v1672_v3 = vld [vmem:[%s3581_s8 + $0x48] sm:$0xff] }
 0x164   : > { %v1352_v16 = vadd.f32 %v1342_v49, %v1273_v37 }
 0x165   : > { %v1363_v47 = vadd.f32 %v1359_v43, %v1351_v20 }
 0x166   : > { %v1364_v13 = vadd.f32 %v1360_v11, %v1352_v16 }
 0x167   : > { %v1369_v21 = vmax.f32 %v1363_v47, 0.0  ;;  %1560 = vmatmul.f32.vlgmr.msra.gmra.mxu1 %v1120_v1 }
 0x168   : > { %v1370_v31 = vmax.f32 %v1364_v13, 0.0  ;;  %v1249_v39 = vpop.f32.mrf.mxu2 }
 0x169   : > { %v1250_v8 = vadd.f32 %v1249_v39, %v1188_v15  ;;  %v1275_v41 = vpop.f32.mrf.mxu3  ;;  %1627 = vmatmul.f32.vlgmr.msra.gmra.mxu2 %v1369_v21  ;;  %v1104_v15 = vadd.f32 %v3366_v63, %v1070_v50 }
 0x16a   : > { %v1276_v14 = vadd.f32 %v1275_v41, %v1214_v23  ;;  %1653 = vmatmul.f32.vlgmr.msra.gmra.mxu3 %v1370_v31 }
 0x16b   : > { %v1353_v35 = vadd.f32 %v1319_v17, %v1250_v8  ;;  %v1128_v0 = vmax.f32 %v1104_v15, 0.0 }
 0x16c   : > { %v1354_v5 = vadd.f32 %v1345_v26, %v1276_v14 }
 0x16d   : > { %v1365_v33 = vadd.f32 %v1359_v43, %v1353_v35 }
 0x16e   : > { %v1366_v18 = vadd.f32 %v1360_v11, %v1354_v5 }
 0x16f   : > { %1563 = vmatmul.f32.gmra.mxu1 %v1124_v10  ;;  %v1371_v38 = vmax.f32 %v1365_v33, 0.0 }
 0x170   : > { %v1372_v4 = vmax.f32 %v1366_v18, 0.0  ;;  %v1252_v24 = vpop.f32.mrf.mxu2 }
 0x171   : > { %v1253_v61 = vadd.f32 %v1252_v24, %v1191_v51  ;;  %v1278_v23 = vpop.f32.mrf.mxu3  ;;  %1630 = vmatmul.f32.gmra.mxu2 %v1371_v38  ;;  %v1108_v51 = vadd.f32 %v3366_v63, %v1074_v44  ;;  %v2171_v24 = vmov 0  }
 0x172   : > { %v1279_v52 = vadd.f32 %v1278_v23, %v1217_v42  ;;  %1656 = vmatmul.f32.gmra.mxu3 %v1372_v4  ;;  %v863_v42 = vadd.f32 %v3178_v58, %v2891_v9  ;;  %v1140_v9 = vmax.f32 %v1116_v32, 0.0  ;;  %v2162_v4 = vld [vmem:[#allocation2] ss:$0 sm:$0xff]  ;;  %2161 = vset.pattern.permute.xlu0 %v2171_v24 }
 0x173   : > { %v1355_v25 = vadd.f32 %v1322_v6, %v1253_v61  ;;  %v1132_v12 = vmax.f32 %v1108_v51, 0.0  ;;  %1691 = vperm.xlu0 %2161, %v2162_v4   ;;  %v1664_v51 = vld [vmem:[%s3581_s8 + $0x8] sm:$0xff]  ;;  %v1675_v32 = vld [vmem:[%s3581_s8 + $0x60] sm:$0xff] }
 0x174   : > { %v1356_v46 = vadd.f32 %v1348_v36, %v1279_v52  ;;  %v1078_v56 = vadd.f32 %v3354_v29, %v863_v42  ;;  %v1665_v42 = vld [vmem:[%s3581_s8 + $0x10] sm:$0xff] }
 0x175   : > { %v1367_v45 = vadd.f32 %v1359_v43, %v1355_v25 }
 0x176   : > { %v1368_v53 = vadd.f32 %v1360_v11, %v1356_v46  ;;  %v1112_v22 = vadd.f32 %v3366_v63, %v1078_v56  ;;  %v1667_v56 = vld [vmem:[%s3581_s8 + $0x20] sm:$0xff] }
 0x177   : > { %1566 = vmatmul.f32.gmra.mxu1 %v1128_v0  ;;  %v1373_v34 = vmax.f32 %v1367_v45, 0.0 }
 0x178   : > { %v1374_v59 = vmax.f32 %v1368_v53, 0.0  ;;  %v1456_v62 = vpop.f32.mrf.mxu2  ;;  %v1136_v49 = vmax.f32 %v1112_v22, 0.0  ;;  %v1668_v22 = vld [vmem:[%s3581_s8 + $0x28] sm:$0xff] }
 0x179   : > { %1633 = vmatmul.f32.gmra.mxu2 %v1373_v34 }
 0x17a   : > { %1659 = vmatmul.f32.gmra.mxu3 %v1374_v59  ;;  %v1663_v59 = vld [vmem:[%s3581_s8] sm:$0xff] }
 0x17f   : > { %1569 = vmatmul.f32.gmra.mxu1 %v1132_v12  ;;  %v1666_v12 = vld [vmem:[%s3581_s8 + $0x18] sm:$0xff] }
 0x180   : > { %v1459_v19 = vpop.f32.mrf.mxu2 }
 0x185   : > { %v1491_v2 = vpop.f32.mrf.mxu3 }
 0x186   : > { %v1492_v7 = vadd.f32 %v1491_v2, %v1456_v62  ;;  %v1669_v62 = vld [vmem:[%s3581_s8 + $0x30] sm:$0xff] }
 0x187   : > { %1572 = vmatmul.f32.gmra.mxu1 %v1136_v49  ;;  %v1671_v49 = vld [vmem:[%s3581_s8 + $0x40] sm:$0xff]  ;;  %v1673_v2 = vld [vmem:[%s3581_s8 + $0x50] sm:$0xff] }
 0x188   : > { %v1462_v29 = vpop.f32.mrf.mxu2 }
 0x18d   : > { %v1494_v58 = vpop.f32.mrf.mxu3 }
 0x18e   : > { %v1495_v43 = vadd.f32 %v1494_v58, %v1459_v19  ;;  %v1676_v19 = vld [vmem:[%s3581_s8 + $0x68] sm:$0xff]  ;;  %v1678_v58 = vld [vmem:[%s3581_s8 + $0x78] sm:$0xff] }
 0x18f   : > { %1575 = vmatmul.f32.gmra.mxu1 %v1140_v9  ;;  %v1677_v9 = vld [vmem:[%s3581_s8 + $0x70] sm:$0xff] }
 0x190   : > { %v1465_v60 = vpop.f32.mrf.mxu2 }
 0x195   : > { %v1497_v37 = vpop.f32.mrf.mxu3 }
 0x196   : > { %v1498_v11 = vadd.f32 %v1497_v37, %v1462_v29  ;;  %v1679_v37 = vld [vmem:[%s3581_s8 + $0x80] sm:$0xff] }
 0x198   : > { %v1468_v17 = vpop.f32.mrf.mxu2 }
 0x19d   : > { %v1500_v47 = vpop.f32.mrf.mxu3 }
 0x19e   : > { %v1501_v52 = vadd.f32 %v1500_v47, %v1465_v60  ;;  %v1682_v60 = vld [vmem:[%s3581_s8 + $0x98] sm:$0xff] }
 0x1a0   : > { %v1471_v26 = vpop.f32.mrf.mxu2 }
 0x1a5   : > { %v1503_v63 = vpop.f32.mrf.mxu3 }
 0x1a6   : > { %v1504_v61 = vadd.f32 %v1503_v63, %v1468_v17  ;;  %v1683_v17 = vld [vmem:[%s3581_s8 + $0xa0] sm:$0xff] }
 0x1ad   : > { %v1506_v39 = vpop.f32.mrf.mxu3 }
 0x1ae   : > { %v1507_v15 = vadd.f32 %v1506_v39, %v1471_v26  ;;  %v1684_v26 = vld [vmem:[%s3581_s8 + $0xa8] sm:$0xff] }
 0x1b4   : > { %v1526_v30 = vpop.f32.mrf.mxu1 }
 0x1b5   : > { %v1527_v20 = vadd.f32 %v1526_v30, %v1492_v7  ;;  %v1674_v7 = vld [vmem:[%s3581_s8 + $0x58] sm:$0xff] }
 0x1bc   : > { %v1529_v16 = vpop.f32.mrf.mxu1 }
 0x1bd   : > { %v1530_v27 = vadd.f32 %v1529_v16, %v1495_v43 }
 0x1c4   : > { %v1532_v55 = vpop.f32.mrf.mxu1 }
 0x1c5   : > { %v1533_v1 = vadd.f32 %v1532_v55, %v1498_v11  ;;  %v1681_v55 = vld [vmem:[%s3581_s8 + $0x90] sm:$0xff] }
 0x1cc   : > { %v1535_v57 = vpop.f32.mrf.mxu1 }
 0x1cd   : > { %v1536_v46 = vadd.f32 %v1535_v57, %v1501_v52 }
 0x1d4   : > { %v1538_v13 = vpop.f32.mrf.mxu1 }
 0x1d5   : > { %v1539_v48 = vadd.f32 %v1538_v13, %v1504_v61 }
 0x1dc   : > { %v1541_v21 = vpop.f32.mrf.mxu1 }
 0x1dd   : > { %v1542_v23 = vadd.f32 %v1541_v21, %v1507_v15 }
 0x1e4   : > { %v1561_v31 = vpop.f32.mrf.mxu1 }
 0x1e5   : > { %v1562_v34 = vadd.f32 %v1561_v31, %v1527_v20  ;;  %v3459_v43 = vpop.permute.xlu0 %1691  ;;  %v1680_v20 = vld [vmem:[%s3581_s8 + $0x88] sm:$0xff] }
 0x1ec   : > { %v1564_v28 = vpop.f32.mrf.mxu1  ;;  %v1628_v8 = vpop.f32.mrf.mxu2 }
 0x1ed   : > { %v1654_v41 = vpop.f32.mrf.mxu3  ;;  %v1565_v53 = vadd.f32 %v1564_v28, %v1530_v27  ;;  %v1685_v28 = vld [vmem:[%s3581_s8 + $0xb0] sm:$0xff] }
 0x1ee   : > { %v1655_v38 = vadd.f32 %v1654_v41, %v1628_v8 }
 0x1f4   : > { %v1567_v14 = vpop.f32.mrf.mxu1  ;;  %v1631_v40 = vpop.f32.mrf.mxu2 }
 0x1f5   : > { %v1657_v35 = vpop.f32.mrf.mxu3  ;;  %v1568_v45 = vadd.f32 %v1567_v14, %v1533_v1  ;;  %v1686_v14 = vld [vmem:[%s3581_s8 + $0xb8] sm:$0xff] }
 0x1f6   : > { %v1658_v18 = vadd.f32 %v1657_v35, %v1631_v40 }
 0x1fc   : > { %v1570_v5 = vpop.f32.mrf.mxu1  ;;  %v1634_v10 = vpop.f32.mrf.mxu2 }
 0x1fd   : > { %v1660_v50 = vpop.f32.mrf.mxu3  ;;  %v1571_v44 = vadd.f32 %v1570_v5, %v1536_v46 }
 0x1fe   : > { %v1661_v33 = vadd.f32 %v1660_v50, %v1634_v10 }
 0x200   : > { %1774 = vmatpush.msrb.mxu0 %v1661_v33 }
 0x202   : > { %1775 = vmatpush.msrb.mxu0 %v1658_v18 }
 0x204   : > { %1776 = vmatpush.msrb.mxu0 %v1655_v38  ;;  %v1573_v6 = vpop.f32.mrf.mxu1 }
 0x205   : > { %v1574_v0 = vadd.f32 %v1573_v6, %v1539_v48 }
 0x20c   : > { %v1576_v36 = vpop.f32.mrf.mxu1 }
 0x20d   : > { %v1577_v25 = vadd.f32 %v1576_v36, %v1542_v23 }
 0x20f   : > { %1777 = vmatpush.msrb.mxu0 %v1577_v25 }
 0x211   : > { %1778 = vmatpush.msrb.mxu0 %v1574_v0 }
 0x213   : > { %1779 = vmatpush.msrb.mxu0 %v1571_v44 }
 0x215   : > { %1780 = vmatpush.msrb.mxu0 %v1568_v45 }
 0x217   : > { %1781 = vmatpush.msrb.mxu0 %v1565_v53 }
 0x219   : > { %1782 = vmatpush.msrb.mxu0 %v1562_v34 }
 0x21a   : > { %2126 = vmatmul.msk.f32.vlgmr.msrb.gmra.mxu0 %vm1694_vm1, %v1663_v59 }
 0x222   : > { %2127 = vmatmul.msk.f32.gmra.mxu0 %vm1694_vm1, %v1664_v51 }
 0x22a   : > { %2128 = vmatmul.msk.f32.gmra.mxu0 %vm1694_vm1, %v1665_v42 }
 0x232   : > { %2129 = vmatmul.msk.f32.gmra.mxu0 %vm1694_vm1, %v1666_v12 }
 0x23a   : > { %2130 = vmatmul.msk.f32.gmra.mxu0 %vm1694_vm1, %v1667_v56 }
 0x242   : > { %2131 = vmatmul.msk.f32.gmra.mxu0 %vm1694_vm1, %v1668_v22 }
 0x24a   : > { %2132 = vmatmul.msk.f32.gmra.mxu0 %vm1694_vm1, %v1669_v62 }
 0x252   : > { %2133 = vmatmul.msk.f32.gmra.mxu0 %vm1694_vm1, %v1670_v54 }
 0x25a   : > { %2134 = vmatmul.msk.f32.gmra.mxu0 %vm1694_vm1, %v1671_v49 }
 0x262   : > { %2135 = vmatmul.msk.f32.gmra.mxu0 %vm1694_vm1, %v1672_v3 }
 0x26a   : > { %2136 = vmatmul.msk.f32.gmra.mxu0 %vm1694_vm1, %v1673_v2 }
 0x272   : > { %2137 = vmatmul.msk.f32.gmra.mxu0 %vm1694_vm1, %v1674_v7 }
 0x27a   : > { %2138 = vmatmul.msk.f32.gmra.mxu0 %vm1694_vm1, %v1675_v32 }
 0x282   : > { %2139 = vmatmul.msk.f32.gmra.mxu0 %vm1694_vm1, %v1676_v19 }
 0x28a   : > { %2140 = vmatmul.msk.f32.gmra.mxu0 %vm1694_vm1, %v1677_v9 }
 0x292   : > { %2141 = vmatmul.msk.f32.gmra.mxu0 %vm1694_vm1, %v1678_v58 }
 0x297   : > { %v1784_v29 = vpop.f32.mrf.mxu0 }
 0x298   : > { %v1785_v11 = vadd.f32 %v1784_v29, %v3459_v43 }
 0x29a   : > { %1856 = vst.msk [vmem:[%s3464_s28] sm:$0xff] %vm551_vm0, %v1785_v11  ;;  %2142 = vmatmul.msk.f32.gmra.mxu0 %vm1694_vm1, %v1679_v37 }
 0x29f   : > { %v1787_v30 = vpop.f32.mrf.mxu0 }
 0x2a0   : > { %v1788_v16 = vadd.f32 %v1787_v30, %v3459_v43 }
 0x2a2   : > { %1857 = vst.msk [vmem:[%s3464_s28 + $0x8] sm:$0xff] %vm551_vm0, %v1788_v16  ;;  %2143 = vmatmul.msk.f32.gmra.mxu0 %vm1694_vm1, %v1680_v20 }
 0x2a7   : > { %v1790_v27 = vpop.f32.mrf.mxu0 }
 0x2a8   : > { %v1791_v1 = vadd.f32 %v1790_v27, %v3459_v43 }
 0x2aa   : > { %1858 = vst.msk [vmem:[%s3464_s28 + $0x10] sm:$0xff] %vm551_vm0, %v1791_v1  ;;  %2144 = vmatmul.msk.f32.gmra.mxu0 %vm1694_vm1, %v1681_v55 }
 0x2af   : > { %v1793_v57 = vpop.f32.mrf.mxu0 }
 0x2b0   : > { %v1794_v47 = vadd.f32 %v1793_v57, %v3459_v43 }
 0x2b2   : > { %1859 = vst.msk [vmem:[%s3464_s28 + $0x18] sm:$0xff] %vm551_vm0, %v1794_v47  ;;  %2145 = vmatmul.msk.f32.gmra.mxu0 %vm1694_vm1, %v1682_v60 }
 0x2b7   : > { %v1796_v13 = vpop.f32.mrf.mxu0 }
 0x2b8   : > { %v1797_v63 = vadd.f32 %v1796_v13, %v3459_v43 }
 0x2ba   : > { %1860 = vst.msk [vmem:[%s3464_s28 + $0x20] sm:$0xff] %vm551_vm0, %v1797_v63  ;;  %2146 = vmatmul.msk.f32.gmra.mxu0 %vm1694_vm1, %v1683_v17 }
 0x2bf   : > { %v1799_v21 = vpop.f32.mrf.mxu0 }
 0x2c0   : > { %v1800_v31 = vadd.f32 %v1799_v21, %v3459_v43 }
 0x2c2   : > { %1861 = vst.msk [vmem:[%s3464_s28 + $0x28] sm:$0xff] %vm551_vm0, %v1800_v31  ;;  %2147 = vmatmul.msk.f32.gmra.mxu0 %vm1694_vm1, %v1684_v26 }
 0x2c7   : > { %v1802_v39 = vpop.f32.mrf.mxu0 }
 0x2c8   : > { %v1803_v8 = vadd.f32 %v1802_v39, %v3459_v43 }
 0x2ca   : > { %1862 = vst.msk [vmem:[%s3464_s28 + $0x30] sm:$0xff] %vm551_vm0, %v1803_v8  ;;  %2148 = vmatmul.msk.f32.gmra.mxu0 %vm1694_vm1, %v1685_v28 }
 0x2cf   : > { %v1805_v41 = vpop.f32.mrf.mxu0 }
 0x2d0   : > { %v1806_v40 = vadd.f32 %v1805_v41, %v3459_v43 }
 0x2d2   : > { %1863 = vst.msk [vmem:[%s3464_s28 + $0x38] sm:$0xff] %vm551_vm0, %v1806_v40  ;;  %2149 = vmatmul.msk.f32.gmra.mxu0 %vm1694_vm1, %v1686_v14 }
 0x2d7   : > { %v1808_v35 = vpop.f32.mrf.mxu0 }
 0x2d8   : > { %v1809_v5 = vadd.f32 %v1808_v35, %v3459_v43 }
 0x2da   : > { %1864 = vst.msk [vmem:[%s3464_s28 + $0x40] sm:$0xff] %vm551_vm0, %v1809_v5 }
 0x2df   : > { %v1811_v10 = vpop.f32.mrf.mxu0 }
 0x2e0   : > { %v1812_v50 = vadd.f32 %v1811_v10, %v3459_v43 }
 0x2e2   : > { %1865 = vst.msk [vmem:[%s3464_s28 + $0x48] sm:$0xff] %vm551_vm0, %v1812_v50 }
 0x2e7   : > { %v1814_v33 = vpop.f32.mrf.mxu0 }
 0x2e8   : > { %v1815_v18 = vadd.f32 %v1814_v33, %v3459_v43 }
 0x2ea   : > { %1866 = vst.msk [vmem:[%s3464_s28 + $0x50] sm:$0xff] %vm551_vm0, %v1815_v18 }
 0x2ef   : > { %v1817_v38 = vpop.f32.mrf.mxu0 }
 0x2f0   : > { %v1818_v4 = vadd.f32 %v1817_v38, %v3459_v43 }
 0x2f2   : > { %1867 = vst.msk [vmem:[%s3464_s28 + $0x58] sm:$0xff] %vm551_vm0, %v1818_v4 }
 0x2f7   : > { %v1820_v24 = vpop.f32.mrf.mxu0 }
 0x2f8   : > { %v1821_v6 = vadd.f32 %v1820_v24, %v3459_v43 }
 0x2fa   : > { %1868 = vst.msk [vmem:[%s3464_s28 + $0x60] sm:$0xff] %vm551_vm0, %v1821_v6 }
 0x2ff   : > { %v1823_v15 = vpop.f32.mrf.mxu0 }
 0x300   : > { %v1824_v61 = vadd.f32 %v1823_v15, %v3459_v43 }
 0x302   : > { %1869 = vst.msk [vmem:[%s3464_s28 + $0x68] sm:$0xff] %vm551_vm0, %v1824_v61 }
 0x307   : > { %v1826_v23 = vpop.f32.mrf.mxu0 }
 0x308   : > { %v1827_v36 = vadd.f32 %v1826_v23, %v3459_v43 }
 0x30a   : > { %1870 = vst.msk [vmem:[%s3464_s28 + $0x70] sm:$0xff] %vm551_vm0, %v1827_v36 }
 0x30f   : > { %v1829_v52 = vpop.f32.mrf.mxu0 }
 0x310   : > { %v1830_v48 = vadd.f32 %v1829_v52, %v3459_v43 }
 0x312   : > { %1871 = vst.msk [vmem:[%s3464_s28 + $0x78] sm:$0xff] %vm551_vm0, %v1830_v48 }
 0x317   : > { %v1832_v25 = vpop.f32.mrf.mxu0 }
 0x318   : > { %v1833_v46 = vadd.f32 %v1832_v25, %v3459_v43 }
 0x31a   : > { %1872 = vst.msk [vmem:[%s3464_s28 + $0x80] sm:$0xff] %vm551_vm0, %v1833_v46 }
 0x31f   : > { %v1835_v0 = vpop.f32.mrf.mxu0 }
 0x320   : > { %v1836_v44 = vadd.f32 %v1835_v0, %v3459_v43 }
 0x322   : > { %1873 = vst.msk [vmem:[%s3464_s28 + $0x88] sm:$0xff] %vm551_vm0, %v1836_v44 }
 0x327   : > { %v1838_v45 = vpop.f32.mrf.mxu0 }
 0x328   : > { %v1839_v53 = vadd.f32 %v1838_v45, %v3459_v43 }
 0x32a   : > { %1874 = vst.msk [vmem:[%s3464_s28 + $0x90] sm:$0xff] %vm551_vm0, %v1839_v53 }
 0x32f   : > { %v1841_v34 = vpop.f32.mrf.mxu0 }
 0x330   : > { %v1842_v59 = vadd.f32 %v1841_v34, %v3459_v43 }
 0x332   : > { %1875 = vst.msk [vmem:[%s3464_s28 + $0x98] sm:$0xff] %vm551_vm0, %v1842_v59 }
 0x337   : > { %v1844_v51 = vpop.f32.mrf.mxu0 }
 0x338   : > { %v1845_v42 = vadd.f32 %v1844_v51, %v3459_v43 }
 0x33a   : > { %1876 = vst.msk [vmem:[%s3464_s28 + $0xa0] sm:$0xff] %vm551_vm0, %v1845_v42 }
 0x33f   : > { %v1847_v12 = vpop.f32.mrf.mxu0 }
 0x340   : > { %v1848_v56 = vadd.f32 %v1847_v12, %v3459_v43 }
 0x342   : > { %1877 = vst.msk [vmem:[%s3464_s28 + $0xa8] sm:$0xff] %vm551_vm0, %v1848_v56 }
 0x347   : > { %v1850_v22 = vpop.f32.mrf.mxu0 }
 0x348   : > { %v1851_v62 = vadd.f32 %v1850_v22, %v3459_v43 }
 0x34a   : > { %1878 = vst.msk [vmem:[%s3464_s28 + $0xb0] sm:$0xff] %vm551_vm0, %v1851_v62 }
 0x34f   : > { %v1853_v54 = vpop.f32.mrf.mxu0 }
 0x350   : > { %v1854_v49 = vadd.f32 %v1853_v54, %v3459_v43 }
 0x352   : > { %1879 = vst.msk [vmem:[%s3464_s28 + $0xb8] sm:$0xff] %vm551_vm0, %v1854_v49 }
 0x353 PF: > { %s22_s15 = sadd.s32 1, %s2169_s15  }
 0x354   : > { %p19_p6 = scmp.ge.s32.totalorder %s22_s15, 4  }
 0x356   :  { %21 = sbr.rel (!%p19_p6) target bundleno = 3 (0x3), region = 97 }

</bundles_post_ra>
